<compile_context>
chip_gen: v7x
topology: tpu7x:2x2x1
jax: 0.10.0
libtpu: 0.0.40
codegen_flags: <defaults>
</compile_context>

<pallas_src>
import math

import jax
import jax.numpy as jnp
from jax.experimental import pallas as pl
from jax.experimental.pallas import tpu as pltpu

# ----------------------- scaled-down GPT-2 config -----------------------
VOCAB = 256          # (50257 in the real config)
N_EMBD = 64          # (768 in the real config; HIDDEN_SIZE)
N_HEAD = 4           # (12 in the real config)
N_LAYER = 2          # (12 in the real config)
MAX_LENGTH = 16      # (128 in the real config)
HEAD_DIM = N_EMBD // N_HEAD
LN_EPS = 1e-5
VMEM_LIMIT = 48 * 1024 * 1024   # safe on v5e/v6e (128 MiB) and v7x (64 MiB) physical VMEM


# ----------------------------- kernel helpers -----------------------------
def _ln(x, g, b):
    # LayerNorm in f32 (x: (rows, D) f32; g, b: (1, D) f32)
    mu = jnp.mean(x, axis=-1, keepdims=True)
    xc = x - mu
    var = jnp.mean(xc * xc, axis=-1, keepdims=True)
    return xc * jax.lax.rsqrt(var + LN_EPS) * g + b


# ------------------- fused transformer block (one pallas_call) -------------------
def _block_kernel(mask_ref, h_ref,
                  ln1_g_ref, ln1_b_ref, attn_w_ref, attn_b_ref,
                  proj_w_ref, proj_b_ref,
                  ln2_g_ref, ln2_b_ref, fc_w_ref, fc_b_ref,
                  mlp_w_ref, mlp_b_ref,
                  o_ref):
    h = h_ref[...]                                             # (T, D) f32 residual stream
    T = h.shape[0]

    # ---- attention sub-block (pre-LN) ----
    x = _ln(h, ln1_g_ref[...], ln1_b_ref[...])                 # f32
    qkv = jnp.dot(x.astype(jnp.bfloat16), attn_w_ref[...],     # bf16 x bf16 -> f32 acc
                  preferred_element_type=jnp.float32) + attn_b_ref[...]   # (T, 3D)

    # causal + padding mask generated in-kernel (no HBM bias tensor)
    row = jax.lax.broadcasted_iota(jnp.int32, (T, T), 0)
    col = jax.lax.broadcasted_iota(jnp.int32, (T, T), 1)
    key_ok = mask_ref[0] > 0.0                                 # (1, T) keys that are valid
    allowed = (col <= row) & key_ok                            # (T, T)
    neg = jnp.float32(-1e9)
    scale = jnp.float32(1.0 / math.sqrt(HEAD_DIM))

    head_outs = []
    for hh in range(N_HEAD):                                   # static per-head loop
        q = qkv[:, hh * HEAD_DIM:(hh + 1) * HEAD_DIM]
        k = qkv[:, N_EMBD + hh * HEAD_DIM:N_EMBD + (hh + 1) * HEAD_DIM]
        v = qkv[:, 2 * N_EMBD + hh * HEAD_DIM:2 * N_EMBD + (hh + 1) * HEAD_DIM]
        s = jax.lax.dot_general(q, k, (((1,), (1,)), ((), ())),
                                preferred_element_type=jnp.float32) * scale
        s = jnp.where(allowed, s, neg)
        m = jnp.max(s, axis=-1, keepdims=True)
        p = jnp.exp(s - m)
        p = p * pl.reciprocal(jnp.sum(p, axis=-1, keepdims=True), approx=True)
        head_outs.append(jnp.dot(p, v, preferred_element_type=jnp.float32))
    attn_out = jnp.concatenate(head_outs, axis=-1)             # (T, D) f32

    # output projection + fused residual add
    h = h + (jnp.dot(attn_out.astype(jnp.bfloat16), proj_w_ref[...],
                     preferred_element_type=jnp.float32) + proj_b_ref[...])

    # ---- MLP sub-block (pre-LN), fused residual add ----
    x = _ln(h, ln2_g_ref[...], ln2_b_ref[...])
    u = jnp.dot(x.astype(jnp.bfloat16), fc_w_ref[...],
                preferred_element_type=jnp.float32) + fc_b_ref[...]
    c = math.sqrt(2.0 / math.pi)                               # GPT-2 "gelu_new"
    u = 0.5 * u * (1.0 + jnp.tanh(c * (u + 0.044715 * u * u * u)))
    h = h + (jnp.dot(u.astype(jnp.bfloat16), mlp_w_ref[...],
                     preferred_element_type=jnp.float32) + mlp_b_ref[...])

    o_ref[...] = h


def transformer_block(h, mask3, blk, B, T):
    # TODO(synk): at the real config (D=768, H=3072) the MLP / QKV weights should be
    # hidden-dim tiled (or single-buffered) to respect v7x's 64 MiB VMEM.
    D = N_EMBD
    return pl.pallas_call(
        _block_kernel,
        out_shape=jax.ShapeDtypeStruct((B * T, D), jnp.float32),
        grid=(B,),
        in_specs=[
            pl.BlockSpec((1, 1, T), lambda b: (b, 0, 0)),       # attention mask
            pl.BlockSpec((T, D), lambda b: (b, 0)),             # residual stream rows
            pl.BlockSpec((1, D), lambda b: (0, 0)),             # ln1_g
            pl.BlockSpec((1, D), lambda b: (0, 0)),             # ln1_b
            pl.BlockSpec((D, 3 * D), lambda b: (0, 0)),         # attn_w (bf16)
            pl.BlockSpec((1, 3 * D), lambda b: (0, 0)),         # attn_b
            pl.BlockSpec((D, D), lambda b: (0, 0)),             # proj_w (bf16)
            pl.BlockSpec((1, D), lambda b: (0, 0)),             # proj_b
            pl.BlockSpec((1, D), lambda b: (0, 0)),             # ln2_g
            pl.BlockSpec((1, D), lambda b: (0, 0)),             # ln2_b
            pl.BlockSpec((D, 4 * D), lambda b: (0, 0)),         # fc_w (bf16)
            pl.BlockSpec((1, 4 * D), lambda b: (0, 0)),         # fc_b
            pl.BlockSpec((4 * D, D), lambda b: (0, 0)),         # mlp_proj_w (bf16)
            pl.BlockSpec((1, D), lambda b: (0, 0)),             # mlp_proj_b
        ],
        out_specs=pl.BlockSpec((T, D), lambda b: (b, 0)),
        compiler_params=pltpu.CompilerParams(
            dimension_semantics=("parallel",),
            vmem_limit_bytes=VMEM_LIMIT,
        ),
    )(mask3, h,
      blk["ln1_g"].reshape(1, D), blk["ln1_b"].reshape(1, D),
      blk["attn_w"], blk["attn_b"].reshape(1, 3 * D),
      blk["proj_w"], blk["proj_b"].reshape(1, D),
      blk["ln2_g"].reshape(1, D), blk["ln2_b"].reshape(1, D),
      blk["fc_w"], blk["fc_b"].reshape(1, 4 * D),
      blk["mlp_proj_w"], blk["mlp_proj_b"].reshape(1, D))


# ------------------- final LN + tied lm_head (vocab-tiled, no wte.T) -------------------
def _lm_head_kernel(h_ref, g_ref, b_ref, wte_ref, o_ref):
    x = _ln(h_ref[...], g_ref[...], b_ref[...])                 # (tm, D) f32
    # contract on wte's feature axis (trans-B); wte is never transposed in HBM
    o_ref[...] = jax.lax.dot_general(
        x.astype(jnp.bfloat16), wte_ref[...],
        dimension_numbers=(((1,), (1,)), ((), ())),
        preferred_element_type=jnp.float32)


def lm_head(h, ln_g, ln_b, wte, tn=128):
    M, D = h.shape
    V = wte.shape[0]
    tm = M if M <= 128 else 128
    assert M % tm == 0 and V % tn == 0
    return pl.pallas_call(
        _lm_head_kernel,
        out_shape=jax.ShapeDtypeStruct((M, V), jnp.float32),
        grid=(M // tm, V // tn),
        in_specs=[
            pl.BlockSpec((tm, D), lambda i, j: (i, 0)),
            pl.BlockSpec((1, D), lambda i, j: (0, 0)),
            pl.BlockSpec((1, D), lambda i, j: (0, 0)),
            pl.BlockSpec((tn, D), lambda i, j: (j, 0)),          # vocab-tiled weight block
        ],
        out_specs=pl.BlockSpec((tm, tn), lambda i, j: (i, j)),   # lane-dense (128-wide) tiles
        compiler_params=pltpu.CompilerParams(
            dimension_semantics=("parallel", "parallel"),
            vmem_limit_bytes=VMEM_LIMIT,
        ),
    )(h, ln_g.reshape(1, D), ln_b.reshape(1, D), wte)


# ----------------------------- parameters -----------------------------
def init_params(key):
    std = 0.02
    proj_std = std / math.sqrt(2 * N_LAYER)  # GPT-2 scaled init for residual projections
    keys = jax.random.split(key, 2 + N_LAYER)
    params = {
        # matmul weights stored in bf16 (f32 MXU accumulation inside the kernels)
        "wte": (jax.random.normal(keys[0], (VOCAB, N_EMBD), jnp.float32) * std).astype(jnp.bfloat16),
        "wpe": jax.random.normal(keys[1], (MAX_LENGTH, N_EMBD), jnp.float32) * std,
        "ln_f_g": jnp.ones((N_EMBD,), jnp.float32),
        "ln_f_b": jnp.zeros((N_EMBD,), jnp.float32),
        "blocks": [],
    }
    for l in range(N_LAYER):
        k = jax.random.split(keys[2 + l], 4)
        params["blocks"].append({
            "ln1_g": jnp.ones((N_EMBD,), jnp.float32),
            "ln1_b": jnp.zeros((N_EMBD,), jnp.float32),
            "attn_w": (jax.random.normal(k[0], (N_EMBD, 3 * N_EMBD), jnp.float32) * std).astype(jnp.bfloat16),
            "attn_b": jnp.zeros((3 * N_EMBD,), jnp.float32),
            "proj_w": (jax.random.normal(k[1], (N_EMBD, N_EMBD), jnp.float32) * proj_std).astype(jnp.bfloat16),
            "proj_b": jnp.zeros((N_EMBD,), jnp.float32),
            "ln2_g": jnp.ones((N_EMBD,), jnp.float32),
            "ln2_b": jnp.zeros((N_EMBD,), jnp.float32),
            "fc_w": (jax.random.normal(k[2], (N_EMBD, 4 * N_EMBD), jnp.float32) * std).astype(jnp.bfloat16),
            "fc_b": jnp.zeros((4 * N_EMBD,), jnp.float32),
            "mlp_proj_w": (jax.random.normal(k[3], (4 * N_EMBD, N_EMBD), jnp.float32) * proj_std).astype(jnp.bfloat16),
            "mlp_proj_b": jnp.zeros((N_EMBD,), jnp.float32),
        })
    return params


# ----------------------------- forward pass -----------------------------
def gpt2_forward(params, input_ids, attention_mask=None, labels=None):
    B, T = input_ids.shape
    assert T <= MAX_LENGTH

    # TODO(synk): embedding lookup is a data-dependent gather; kept as jnp.take glue
    # rather than a DMA-gather kernel.
    h = (jnp.take(params["wte"], input_ids, axis=0).astype(jnp.float32)
         + params["wpe"][:T][None, :, :])
    h = h.reshape(B * T, N_EMBD)

    if attention_mask is None:
        attention_mask = jnp.ones((B, T), dtype=jnp.int32)
    mask3 = attention_mask.astype(jnp.float32).reshape(B, 1, T)   # only a (B,1,T) mask hits HBM

    for blk in params["blocks"]:
        h = transformer_block(h, mask3, blk, B, T)

    # final LN fused into the tied lm_head kernel (contracts wte without transposing it)
    logits = lm_head(h, params["ln_f_g"], params["ln_f_b"], params["wte"])
    logits = logits.reshape(B, T, VOCAB)

    if labels is not None:
        # HF GPT2LMHeadModel: shift by one, mean cross-entropy with ignore_index=-100.
        # TODO(synk): cross-entropy loss computed in JAX glue (scalar reduction), not in Pallas.
        shift_logits = logits[:, :-1, :]
        shift_labels = labels[:, 1:]
        valid = (shift_labels != -100)
        safe_labels = jnp.where(valid, shift_labels, 0)
        logp = jax.nn.log_softmax(shift_logits, axis=-1)
        nll = -jnp.take_along_axis(logp, safe_labels[..., None], axis=-1)[..., 0]
        denom = jnp.maximum(jnp.sum(valid.astype(jnp.float32)), 1.0)
        loss = jnp.sum(nll * valid.astype(jnp.float32)) / denom
        return loss, logits
    return logits


# ----------------------------- demo -----------------------------
if __name__ == "__main__":
    key = jax.random.PRNGKey(0)
    pkey, dkey = jax.random.split(key)
    params = init_params(pkey)

    B, T = 2, 8
    input_ids = jax.random.randint(dkey, (B, T), 0, VOCAB, dtype=jnp.int32)
    attention_mask = jnp.ones((B, T), dtype=jnp.int32)
    labels = input_ids

    fwd = jax.jit(gpt2_forward)
    loss, logits = fwd(params, input_ids, attention_mask, labels)
    jax.block_until_ready((loss, logits))

    assert logits.shape == (B, T, VOCAB)
    assert logits.dtype == jnp.float32
    assert jnp.isfinite(loss)
    print("KERNEL_OK")
</pallas_src>

<mosaic_0001>
module attributes {stable_mosaic.version = 11 : i64} {
  func.func @_lm_head_kernel(%arg0: i32, %arg1: i32, %arg2: memref<16x64xf32, #tpu.memory_space<vmem>>, %arg3: memref<1x64xf32, #tpu.memory_space<vmem>>, %arg4: memref<1x64xf32, #tpu.memory_space<vmem>>, %arg5: memref<128x64xbf16, #tpu.memory_space<vmem>>, %arg6: memref<16x128xf32, #tpu.memory_space<vmem>>) attributes {dimension_semantics = [#tpu.dimension_semantics<parallel>, #tpu.dimension_semantics<parallel>], iteration_bounds = array<i64: 1, 2>, scalar_prefetch = 0 : i64, scratch_operands = 0 : i64, tpu.core_type = #tpu.core_type<tc>, window_params = [{transform_indices = @transform_0, window_bounds = array<i64: 16, 64>}, {pipeline_mode = #tpu.pipeline_mode<synchronous>, transform_indices = @transform_1, window_bounds = array<i64: 1, 64>}, {pipeline_mode = #tpu.pipeline_mode<synchronous>, transform_indices = @transform_2, window_bounds = array<i64: 1, 64>}, {transform_indices = @transform_3, window_bounds = array<i64: 128, 64>}, {transform_indices = @transform_4, window_bounds = array<i64: 16, 128>}]} {
    %c0 = arith.constant 0 : index
    %c0_0 = arith.constant 0 : index
    %0 = vector.load %arg2[%c0, %c0_0] : memref<16x64xf32, #tpu.memory_space<vmem>>, vector<16x64xf32>
    %c0_1 = arith.constant 0 : index
    %c0_2 = arith.constant 0 : index
    %1 = vector.load %arg3[%c0_1, %c0_2] : memref<1x64xf32, #tpu.memory_space<vmem>>, vector<1x64xf32>
    %c0_3 = arith.constant 0 : index
    %c0_4 = arith.constant 0 : index
    %2 = vector.load %arg4[%c0_3, %c0_4] : memref<1x64xf32, #tpu.memory_space<vmem>>, vector<1x64xf32>
    %cst = arith.constant dense<0.000000e+00> : vector<16xf32>
    %3 = vector.multi_reduction <add>, %0, %cst [1] : vector<16x64xf32> to vector<16xf32>
    %4 = vector.shape_cast %3 : vector<16xf32> to vector<16x1xf32>
    %cst_5 = arith.constant 6.400000e+01 : f32
    %5 = vector.broadcast %cst_5 : f32 to vector<16x1xf32>
    %6 = arith.divf %4, %5 : vector<16x1xf32>
    %7 = vector.broadcast %6 : vector<16x1xf32> to vector<16x64xf32>
    %8 = arith.subf %0, %7 : vector<16x64xf32>
    %9 = arith.mulf %8, %8 : vector<16x64xf32>
    %cst_6 = arith.constant dense<0.000000e+00> : vector<16xf32>
    %10 = vector.multi_reduction <add>, %9, %cst_6 [1] : vector<16x64xf32> to vector<16xf32>
    %11 = vector.shape_cast %10 : vector<16xf32> to vector<16x1xf32>
    %cst_7 = arith.constant 6.400000e+01 : f32
    %12 = vector.broadcast %cst_7 : f32 to vector<16x1xf32>
    %13 = arith.divf %11, %12 : vector<16x1xf32>
    %cst_8 = arith.constant 9.99999974E-6 : f32
    %14 = vector.broadcast %cst_8 : f32 to vector<16x1xf32>
    %15 = arith.addf %13, %14 : vector<16x1xf32>
    %16 = math.rsqrt %15 : vector<16x1xf32>
    %17 = vector.broadcast %16 : vector<16x1xf32> to vector<16x64xf32>
    %18 = arith.mulf %8, %17 : vector<16x64xf32>
    %19 = vector.broadcast %1 : vector<1x64xf32> to vector<16x64xf32>
    %20 = arith.mulf %18, %19 : vector<16x64xf32>
    %21 = vector.broadcast %2 : vector<1x64xf32> to vector<16x64xf32>
    %22 = arith.addf %20, %21 : vector<16x64xf32>
    %23 = arith.truncf %22 : vector<16x64xf32> to vector<16x64xbf16>
    %c0_9 = arith.constant 0 : index
    %c0_10 = arith.constant 0 : index
    %24 = vector.load %arg5[%c0_9, %c0_10] : memref<128x64xbf16, #tpu.memory_space<vmem>>, vector<128x64xbf16>
    %cst_11 = arith.constant dense<0.000000e+00> : vector<16x128xf32>
    %25 = tpu.matmul %23, %24, %cst_11 {dimension_numbers = #tpu.dot_dimension_numbers<[1], [1], [0], [0], [0, 0, 1, 0], [], []>} : vector<16x64xbf16>, vector<128x64xbf16>, vector<16x128xf32> -> vector<16x128xf32>
    %c0_12 = arith.constant 0 : index
    %c0_13 = arith.constant 0 : index
    %26 = vector.load %arg6[%c0_12, %c0_13] : memref<16x128xf32, #tpu.memory_space<vmem>>, vector<16x128xf32>
    tpu.vector_store %arg6[%c0_12, %c0_13], %25 {strides = array<i32>} : memref<16x128xf32, #tpu.memory_space<vmem>>, vector<16x128xf32>,
    return
  }
  func.func @transform_0(%arg0: i32, %arg1: i32) -> (i32, i32) {
    %c0_i32 = arith.constant 0 : i32
    %c0_i32_0 = arith.constant 0 : i32
    return %arg0, %c0_i32 : i32, i32
  }
  func.func @transform_1(%arg0: i32, %arg1: i32) -> (i32, i32) {
    %c0_i32 = arith.constant 0 : i32
    %c0_i32_0 = arith.constant 0 : i32
    %c0_i32_1 = arith.constant 0 : i32
    return %c0_i32, %c0_i32_0 : i32, i32
  }
  func.func @transform_2(%arg0: i32, %arg1: i32) -> (i32, i32) {
    %c0_i32 = arith.constant 0 : i32
    %c0_i32_0 = arith.constant 0 : i32
    %c0_i32_1 = arith.constant 0 : i32
    return %c0_i32, %c0_i32_0 : i32, i32
  }
  func.func @transform_3(%arg0: i32, %arg1: i32) -> (i32, i32) {
    %c0_i32 = arith.constant 0 : i32
    %c0_i32_0 = arith.constant 0 : i32
    return %arg1, %c0_i32 : i32, i32
  }
  func.func @transform_4(%arg0: i32, %arg1: i32) -> (i32, i32) {
    %c0_i32 = arith.constant 0 : i32
    return %arg0, %arg1 : i32, i32
  }
}

module attributes {stable_mosaic.version = 11 : i64} {
  func.func @_block_kernel(%arg0: i32, %arg1: memref<1x1x8xf32, #tpu.memory_space<vmem>>, %arg2: memref<8x64xf32, #tpu.memory_space<vmem>>, %arg3: memref<1x64xf32, #tpu.memory_space<vmem>>, %arg4: memref<1x64xf32, #tpu.memory_space<vmem>>, %arg5: memref<64x192xbf16, #tpu.memory_space<vmem>>, %arg6: memref<1x192xf32, #tpu.memory_space<vmem>>, %arg7: memref<64x64xbf16, #tpu.memory_space<vmem>>, %arg8: memref<1x64xf32, #tpu.memory_space<vmem>>, %arg9: memref<1x64xf32, #tpu.memory_space<vmem>>, %arg10: memref<1x64xf32, #tpu.memory_space<vmem>>, %arg11: memref<64x256xbf16, #tpu.memory_space<vmem>>, %arg12: memref<1x256xf32, #tpu.memory_space<vmem>>, %arg13: memref<256x64xbf16, #tpu.memory_space<vmem>>, %arg14: memref<1x64xf32, #tpu.memory_space<vmem>>, %arg15: memref<8x64xf32, #tpu.memory_space<vmem>>) attributes {dimension_semantics = [#tpu.dimension_semantics<parallel>], iteration_bounds = array<i64: 2>, scalar_prefetch = 0 : i64, scratch_operands = 0 : i64, tpu.core_type = #tpu.core_type<tc>, window_params = [{transform_indices = @transform_0, window_bounds = array<i64: 1, 1, 8>}, {transform_indices = @transform_1, window_bounds = array<i64: 8, 64>}, {pipeline_mode = #tpu.pipeline_mode<synchronous>, transform_indices = @transform_2, window_bounds = array<i64: 1, 64>}, {pipeline_mode = #tpu.pipeline_mode<synchronous>, transform_indices = @transform_3, window_bounds = array<i64: 1, 64>}, {pipeline_mode = #tpu.pipeline_mode<synchronous>, transform_indices = @transform_4, window_bounds = array<i64: 64, 192>}, {pipeline_mode = #tpu.pipeline_mode<synchronous>, transform_indices = @transform_5, window_bounds = array<i64: 1, 192>}, {pipeline_mode = #tpu.pipeline_mode<synchronous>, transform_indices = @transform_6, window_bounds = array<i64: 64, 64>}, {pipeline_mode = #tpu.pipeline_mode<synchronous>, transform_indices = @transform_7, window_bounds = array<i64: 1, 64>}, {pipeline_mode = #tpu.pipeline_mode<synchronous>, transform_indices = @transform_8, window_bounds = array<i64: 1, 64>}, {pipeline_mode = #tpu.pipeline_mode<synchronous>, transform_indices = @transform_9, window_bounds = array<i64: 1, 64>}, {pipeline_mode = #tpu.pipeline_mode<synchronous>, transform_indices = @transform_10, window_bounds = array<i64: 64, 256>}, {pipeline_mode = #tpu.pipeline_mode<synchronous>, transform_indices = @transform_11, window_bounds = array<i64: 1, 256>}, {pipeline_mode = #tpu.pipeline_mode<synchronous>, transform_indices = @transform_12, window_bounds = array<i64: 256, 64>}, {pipeline_mode = #tpu.pipeline_mode<synchronous>, transform_indices = @transform_13, window_bounds = array<i64: 1, 64>}, {transform_indices = @transform_14, window_bounds = array<i64: 8, 64>}]} {
    %c0 = arith.constant 0 : index
    %c0_0 = arith.constant 0 : index
    %0 = vector.load %arg2[%c0, %c0_0] : memref<8x64xf32, #tpu.memory_space<vmem>>, vector<8x64xf32>
    %c0_1 = arith.constant 0 : index
    %c0_2 = arith.constant 0 : index
    %1 = vector.load %arg3[%c0_1, %c0_2] : memref<1x64xf32, #tpu.memory_space<vmem>>, vector<1x64xf32>
    %c0_3 = arith.constant 0 : index
    %c0_4 = arith.constant 0 : index
    %2 = vector.load %arg4[%c0_3, %c0_4] : memref<1x64xf32, #tpu.memory_space<vmem>>, vector<1x64xf32>
    %cst = arith.constant dense<0.000000e+00> : vector<8xf32>
    %3 = vector.multi_reduction <add>, %0, %cst [1] : vector<8x64xf32> to vector<8xf32>
    %4 = vector.shape_cast %3 : vector<8xf32> to vector<8x1xf32>
    %cst_5 = arith.constant 6.400000e+01 : f32
    %5 = vector.broadcast %cst_5 : f32 to vector<8x1xf32>
    %6 = arith.divf %4, %5 : vector<8x1xf32>
    %7 = vector.broadcast %6 : vector<8x1xf32> to vector<8x64xf32>
    %8 = arith.subf %0, %7 : vector<8x64xf32>
    %9 = arith.mulf %8, %8 : vector<8x64xf32>
    %cst_6 = arith.constant dense<0.000000e+00> : vector<8xf32>
    %10 = vector.multi_reduction <add>, %9, %cst_6 [1] : vector<8x64xf32> to vector<8xf32>
    %11 = vector.shape_cast %10 : vector<8xf32> to vector<8x1xf32>
    %cst_7 = arith.constant 6.400000e+01 : f32
    %12 = vector.broadcast %cst_7 : f32 to vector<8x1xf32>
    %13 = arith.divf %11, %12 : vector<8x1xf32>
    %cst_8 = arith.constant 9.99999974E-6 : f32
    %14 = vector.broadcast %cst_8 : f32 to vector<8x1xf32>
    %15 = arith.addf %13, %14 : vector<8x1xf32>
    %16 = math.rsqrt %15 : vector<8x1xf32>
    %17 = vector.broadcast %16 : vector<8x1xf32> to vector<8x64xf32>
    %18 = arith.mulf %8, %17 : vector<8x64xf32>
    %19 = vector.broadcast %1 : vector<1x64xf32> to vector<8x64xf32>
    %20 = arith.mulf %18, %19 : vector<8x64xf32>
    %21 = vector.broadcast %2 : vector<1x64xf32> to vector<8x64xf32>
    %22 = arith.addf %20, %21 : vector<8x64xf32>
    %23 = arith.truncf %22 : vector<8x64xf32> to vector<8x64xbf16>
    %c0_9 = arith.constant 0 : index
    %c0_10 = arith.constant 0 : index
    %24 = vector.load %arg5[%c0_9, %c0_10] : memref<64x192xbf16, #tpu.memory_space<vmem>>, vector<64x192xbf16>
    %cst_11 = arith.constant dense<0.000000e+00> : vector<8x192xf32>
    %25 = tpu.matmul %23, %24, %cst_11 {dimension_numbers = #tpu.dot_dimension_numbers<[1], [0], [0], [1], [0, 0, 1, 1], [], []>} : vector<8x64xbf16>, vector<64x192xbf16>, vector<8x192xf32> -> vector<8x192xf32>
    %c0_12 = arith.constant 0 : index
    %c0_13 = arith.constant 0 : index
    %26 = vector.load %arg6[%c0_12, %c0_13] : memref<1x192xf32, #tpu.memory_space<vmem>>, vector<1x192xf32>
    %27 = vector.broadcast %26 : vector<1x192xf32> to vector<8x192xf32>
    %28 = arith.addf %25, %27 : vector<8x192xf32>
    %29 = tpu.iota {dimensions = array<i32: 0>} : vector<8x8xi32>
    %30 = tpu.iota {dimensions = array<i32: 1>} : vector<8x8xi32>
    %c0_14 = arith.constant 0 : index
    %c0_15 = arith.constant 0 : index
    %c0_16 = arith.constant 0 : index
    %31 = vector.load %arg1[%c0_14, %c0_15, %c0_16] : memref<1x1x8xf32, #tpu.memory_space<vmem>>, vector<1x1x8xf32>
    %32 = vector.shape_cast %31 : vector<1x1x8xf32> to vector<1x8xf32>
    %cst_17 = arith.constant 0.000000e+00 : f32
    %33 = vector.broadcast %cst_17 : f32 to vector<1x8xf32>
    %34 = arith.cmpf ogt, %32, %33 : vector<1x8xf32>
    %35 = arith.cmpi sle, %30, %29 : vector<8x8xi32>
    %36 = vector.broadcast %34 : vector<1x8xi1> to vector<8x8xi1>
    %37 = arith.andi %35, %36 : vector<8x8xi1>
    %38 = vector.extract_strided_slice %28 {offsets = [0, 0], sizes = [8, 16], strides = [1, 1]} : vector<8x192xf32> to vector<8x16xf32>
    %39 = vector.extract_strided_slice %28 {offsets = [0, 64], sizes = [8, 16], strides = [1, 1]} : vector<8x192xf32> to vector<8x16xf32>
    %40 = vector.extract_strided_slice %28 {offsets = [0, 128], sizes = [8, 16], strides = [1, 1]} : vector<8x192xf32> to vector<8x16xf32>
    %cst_18 = arith.constant dense<0.000000e+00> : vector<8x8xf32>
    %41 = tpu.matmul %38, %39, %cst_18 {dimension_numbers = #tpu.dot_dimension_numbers<[1], [1], [0], [0], [0, 0, 1, 0], [], []>} : vector<8x16xf32>, vector<8x16xf32>, vector<8x8xf32> -> vector<8x8xf32>
    %cst_19 = arith.constant 2.500000e-01 : f32
    %42 = vector.broadcast %cst_19 : f32 to vector<8x8xf32>
    %43 = arith.mulf %41, %42 : vector<8x8xf32>
    %cst_20 = arith.constant -1.000000e+09 : f32
    %44 = vector.broadcast %cst_20 : f32 to vector<8x8xf32>
    %45 = arith.select %37, %43, %44 : vector<8x8xi1>, vector<8x8xf32>
    %cst_21 = arith.constant dense<0xFF800000> : vector<8xf32>
    %46 = vector.multi_reduction <maximumf>, %45, %cst_21 [1] : vector<8x8xf32> to vector<8xf32>
    %47 = vector.shape_cast %46 : vector<8xf32> to vector<8x1xf32>
    %48 = vector.broadcast %47 : vector<8x1xf32> to vector<8x8xf32>
    %49 = arith.subf %45, %48 : vector<8x8xf32>
    %50 = math.exp %49 : vector<8x8xf32>
    %cst_22 = arith.constant dense<0.000000e+00> : vector<8xf32>
    %51 = vector.multi_reduction <add>, %50, %cst_22 [1] : vector<8x8xf32> to vector<8xf32>
    %52 = vector.shape_cast %51 : vector<8xf32> to vector<8x1xf32>
    %53 = tpu.reciprocal %52 {approx = true} : vector<8x1xf32> -> vector<8x1xf32>
    %54 = vector.broadcast %53 : vector<8x1xf32> to vector<8x8xf32>
    %55 = arith.mulf %50, %54 : vector<8x8xf32>
    %cst_23 = arith.constant dense<0.000000e+00> : vector<8x16xf32>
    %56 = tpu.matmul %55, %40, %cst_23 {dimension_numbers = #tpu.dot_dimension_numbers<[1], [0], [0], [1], [0, 0, 1, 1], [], []>} : vector<8x8xf32>, vector<8x16xf32>, vector<8x16xf32> -> vector<8x16xf32>
    %57 = vector.extract_strided_slice %28 {offsets = [0, 16], sizes = [8, 16], strides = [1, 1]} : vector<8x192xf32> to vector<8x16xf32>
    %58 = vector.extract_strided_slice %28 {offsets = [0, 80], sizes = [8, 16], strides = [1, 1]} : vector<8x192xf32> to vector<8x16xf32>
    %59 = vector.extract_strided_slice %28 {offsets = [0, 144], sizes = [8, 16], strides = [1, 1]} : vector<8x192xf32> to vector<8x16xf32>
    %cst_24 = arith.constant dense<0.000000e+00> : vector<8x8xf32>
    %60 = tpu.matmul %57, %58, %cst_24 {dimension_numbers = #tpu.dot_dimension_numbers<[1], [1], [0], [0], [0, 0, 1, 0], [], []>} : vector<8x16xf32>, vector<8x16xf32>, vector<8x8xf32> -> vector<8x8xf32>
    %cst_25 = arith.constant 2.500000e-01 : f32
    %61 = vector.broadcast %cst_25 : f32 to vector<8x8xf32>
    %62 = arith.mulf %60, %61 : vector<8x8xf32>
    %cst_26 = arith.constant -1.000000e+09 : f32
    %63 = vector.broadcast %cst_26 : f32 to vector<8x8xf32>
    %64 = arith.select %37, %62, %63 : vector<8x8xi1>, vector<8x8xf32>
    %cst_27 = arith.constant dense<0xFF800000> : vector<8xf32>
    %65 = vector.multi_reduction <maximumf>, %64, %cst_27 [1] : vector<8x8xf32> to vector<8xf32>
    %66 = vector.shape_cast %65 : vector<8xf32> to vector<8x1xf32>
    %67 = vector.broadcast %66 : vector<8x1xf32> to vector<8x8xf32>
    %68 = arith.subf %64, %67 : vector<8x8xf32>
    %69 = math.exp %68 : vector<8x8xf32>
    %cst_28 = arith.constant dense<0.000000e+00> : vector<8xf32>
    %70 = vector.multi_reduction <add>, %69, %cst_28 [1] : vector<8x8xf32> to vector<8xf32>
    %71 = vector.shape_cast %70 : vector<8xf32> to vector<8x1xf32>
    %72 = tpu.reciprocal %71 {approx = true} : vector<8x1xf32> -> vector<8x1xf32>
    %73 = vector.broadcast %72 : vector<8x1xf32> to vector<8x8xf32>
    %74 = arith.mulf %69, %73 : vector<8x8xf32>
    %cst_29 = arith.constant dense<0.000000e+00> : vector<8x16xf32>
    %75 = tpu.matmul %74, %59, %cst_29 {dimension_numbers = #tpu.dot_dimension_numbers<[1], [0], [0], [1], [0, 0, 1, 1], [], []>} : vector<8x8xf32>, vector<8x16xf32>, vector<8x16xf32> -> vector<8x16xf32>
    %76 = vector.extract_strided_slice %28 {offsets = [0, 32], sizes = [8, 16], strides = [1, 1]} : vector<8x192xf32> to vector<8x16xf32>
    %77 = vector.extract_strided_slice %28 {offsets = [0, 96], sizes = [8, 16], strides = [1, 1]} : vector<8x192xf32> to vector<8x16xf32>
    %78 = vector.extract_strided_slice %28 {offsets = [0, 160], sizes = [8, 16], strides = [1, 1]} : vector<8x192xf32> to vector<8x16xf32>
    %cst_30 = arith.constant dense<0.000000e+00> : vector<8x8xf32>
    %79 = tpu.matmul %76, %77, %cst_30 {dimension_numbers = #tpu.dot_dimension_numbers<[1], [1], [0], [0], [0, 0, 1, 0], [], []>} : vector<8x16xf32>, vector<8x16xf32>, vector<8x8xf32> -> vector<8x8xf32>
    %cst_31 = arith.constant 2.500000e-01 : f32
    %80 = vector.broadcast %cst_31 : f32 to vector<8x8xf32>
    %81 = arith.mulf %79, %80 : vector<8x8xf32>
    %cst_32 = arith.constant -1.000000e+09 : f32
    %82 = vector.broadcast %cst_32 : f32 to vector<8x8xf32>
    %83 = arith.select %37, %81, %82 : vector<8x8xi1>, vector<8x8xf32>
    %cst_33 = arith.constant dense<0xFF800000> : vector<8xf32>
    %84 = vector.multi_reduction <maximumf>, %83, %cst_33 [1] : vector<8x8xf32> to vector<8xf32>
    %85 = vector.shape_cast %84 : vector<8xf32> to vector<8x1xf32>
    %86 = vector.broadcast %85 : vector<8x1xf32> to vector<8x8xf32>
    %87 = arith.subf %83, %86 : vector<8x8xf32>
    %88 = math.exp %87 : vector<8x8xf32>
    %cst_34 = arith.constant dense<0.000000e+00> : vector<8xf32>
    %89 = vector.multi_reduction <add>, %88, %cst_34 [1] : vector<8x8xf32> to vector<8xf32>
    %90 = vector.shape_cast %89 : vector<8xf32> to vector<8x1xf32>
    %91 = tpu.reciprocal %90 {approx = true} : vector<8x1xf32> -> vector<8x1xf32>
    %92 = vector.broadcast %91 : vector<8x1xf32> to vector<8x8xf32>
    %93 = arith.mulf %88, %92 : vector<8x8xf32>
    %cst_35 = arith.constant dense<0.000000e+00> : vector<8x16xf32>
    %94 = tpu.matmul %93, %78, %cst_35 {dimension_numbers = #tpu.dot_dimension_numbers<[1], [0], [0], [1], [0, 0, 1, 1], [], []>} : vector<8x8xf32>, vector<8x16xf32>, vector<8x16xf32> -> vector<8x16xf32>
    %95 = vector.extract_strided_slice %28 {offsets = [0, 48], sizes = [8, 16], strides = [1, 1]} : vector<8x192xf32> to vector<8x16xf32>
    %96 = vector.extract_strided_slice %28 {offsets = [0, 112], sizes = [8, 16], strides = [1, 1]} : vector<8x192xf32> to vector<8x16xf32>
    %97 = vector.extract_strided_slice %28 {offsets = [0, 176], sizes = [8, 16], strides = [1, 1]} : vector<8x192xf32> to vector<8x16xf32>
    %cst_36 = arith.constant dense<0.000000e+00> : vector<8x8xf32>
    %98 = tpu.matmul %95, %96, %cst_36 {dimension_numbers = #tpu.dot_dimension_numbers<[1], [1], [0], [0], [0, 0, 1, 0], [], []>} : vector<8x16xf32>, vector<8x16xf32>, vector<8x8xf32> -> vector<8x8xf32>
    %cst_37 = arith.constant 2.500000e-01 : f32
    %99 = vector.broadcast %cst_37 : f32 to vector<8x8xf32>
    %100 = arith.mulf %98, %99 : vector<8x8xf32>
    %cst_38 = arith.constant -1.000000e+09 : f32
    %101 = vector.broadcast %cst_38 : f32 to vector<8x8xf32>
    %102 = arith.select %37, %100, %101 : vector<8x8xi1>, vector<8x8xf32>
    %cst_39 = arith.constant dense<0xFF800000> : vector<8xf32>
    %103 = vector.multi_reduction <maximumf>, %102, %cst_39 [1] : vector<8x8xf32> to vector<8xf32>
    %104 = vector.shape_cast %103 : vector<8xf32> to vector<8x1xf32>
    %105 = vector.broadcast %104 : vector<8x1xf32> to vector<8x8xf32>
    %106 = arith.subf %102, %105 : vector<8x8xf32>
    %107 = math.exp %106 : vector<8x8xf32>
    %cst_40 = arith.constant dense<0.000000e+00> : vector<8xf32>
    %108 = vector.multi_reduction <add>, %107, %cst_40 [1] : vector<8x8xf32> to vector<8xf32>
    %109 = vector.shape_cast %108 : vector<8xf32> to vector<8x1xf32>
    %110 = tpu.reciprocal %109 {approx = true} : vector<8x1xf32> -> vector<8x1xf32>
    %111 = vector.broadcast %110 : vector<8x1xf32> to vector<8x8xf32>
    %112 = arith.mulf %107, %111 : vector<8x8xf32>
    %cst_41 = arith.constant dense<0.000000e+00> : vector<8x16xf32>
    %113 = tpu.matmul %112, %97, %cst_41 {dimension_numbers = #tpu.dot_dimension_numbers<[1], [0], [0], [1], [0, 0, 1, 1], [], []>} : vector<8x8xf32>, vector<8x16xf32>, vector<8x16xf32> -> vector<8x16xf32>
    %114 = tpu.concatenate %56, %75, %94, %113 in 1 : vector<8x16xf32>, vector<8x16xf32>, vector<8x16xf32>, vector<8x16xf32> -> vector<8x64xf32>
    %115 = arith.truncf %114 : vector<8x64xf32> to vector<8x64xbf16>
    %c0_42 = arith.constant 0 : index
    %c0_43 = arith.constant 0 : index
    %116 = vector.load %arg7[%c0_42, %c0_43] : memref<64x64xbf16, #tpu.memory_space<vmem>>, vector<64x64xbf16>
    %cst_44 = arith.constant dense<0.000000e+00> : vector<8x64xf32>
    %117 = tpu.matmul %115, %116, %cst_44 {dimension_numbers = #tpu.dot_dimension_numbers<[1], [0], [0], [1], [0, 0, 1, 1], [], []>} : vector<8x64xbf16>, vector<64x64xbf16>, vector<8x64xf32> -> vector<8x64xf32>
    %c0_45 = arith.constant 0 : index
    %c0_46 = arith.constant 0 : index
    %118 = vector.load %arg8[%c0_45, %c0_46] : memref<1x64xf32, #tpu.memory_space<vmem>>, vector<1x64xf32>
    %119 = vector.broadcast %118 : vector<1x64xf32> to vector<8x64xf32>
    %120 = arith.addf %117, %119 : vector<8x64xf32>
    %121 = arith.addf %0, %120 : vector<8x64xf32>
    %c0_47 = arith.constant 0 : index
    %c0_48 = arith.constant 0 : index
    %122 = vector.load %arg9[%c0_47, %c0_48] : memref<1x64xf32, #tpu.memory_space<vmem>>, vector<1x64xf32>
    %c0_49 = arith.constant 0 : index
    %c0_50 = arith.constant 0 : index
    %123 = vector.load %arg10[%c0_49, %c0_50] : memref<1x64xf32, #tpu.memory_space<vmem>>, vector<1x64xf32>
    %cst_51 = arith.constant dense<0.000000e+00> : vector<8xf32>
    %124 = vector.multi_reduction <add>, %121, %cst_51 [1] : vector<8x64xf32> to vector<8xf32>
    %125 = vector.shape_cast %124 : vector<8xf32> to vector<8x1xf32>
    %cst_52 = arith.constant 6.400000e+01 : f32
    %126 = vector.broadcast %cst_52 : f32 to vector<8x1xf32>
    %127 = arith.divf %125, %126 : vector<8x1xf32>
    %128 = vector.broadcast %127 : vector<8x1xf32> to vector<8x64xf32>
    %129 = arith.subf %121, %128 : vector<8x64xf32>
    %130 = arith.mulf %129, %129 : vector<8x64xf32>
    %cst_53 = arith.constant dense<0.000000e+00> : vector<8xf32>
    %131 = vector.multi_reduction <add>, %130, %cst_53 [1] : vector<8x64xf32> to vector<8xf32>
    %132 = vector.shape_cast %131 : vector<8xf32> to vector<8x1xf32>
    %cst_54 = arith.constant 6.400000e+01 : f32
    %133 = vector.broadcast %cst_54 : f32 to vector<8x1xf32>
    %134 = arith.divf %132, %133 : vector<8x1xf32>
    %cst_55 = arith.constant 9.99999974E-6 : f32
    %135 = vector.broadcast %cst_55 : f32 to vector<8x1xf32>
    %136 = arith.addf %134, %135 : vector<8x1xf32>
    %137 = math.rsqrt %136 : vector<8x1xf32>
    %138 = vector.broadcast %137 : vector<8x1xf32> to vector<8x64xf32>
    %139 = arith.mulf %129, %138 : vector<8x64xf32>
    %140 = vector.broadcast %122 : vector<1x64xf32> to vector<8x64xf32>
    %141 = arith.mulf %139, %140 : vector<8x64xf32>
    %142 = vector.broadcast %123 : vector<1x64xf32> to vector<8x64xf32>
    %143 = arith.addf %141, %142 : vector<8x64xf32>
    %144 = arith.truncf %143 : vector<8x64xf32> to vector<8x64xbf16>
    %c0_56 = arith.constant 0 : index
    %c0_57 = arith.constant 0 : index
    %145 = vector.load %arg11[%c0_56, %c0_57] : memref<64x256xbf16, #tpu.memory_space<vmem>>, vector<64x256xbf16>
    %cst_58 = arith.constant dense<0.000000e+00> : vector<8x256xf32>
    %146 = tpu.matmul %144, %145, %cst_58 {dimension_numbers = #tpu.dot_dimension_numbers<[1], [0], [0], [1], [0, 0, 1, 1], [], []>} : vector<8x64xbf16>, vector<64x256xbf16>, vector<8x256xf32> -> vector<8x256xf32>
    %c0_59 = arith.constant 0 : index
    %c0_60 = arith.constant 0 : index
    %147 = vector.load %arg12[%c0_59, %c0_60] : memref<1x256xf32, #tpu.memory_space<vmem>>, vector<1x256xf32>
    %148 = vector.broadcast %147 : vector<1x256xf32> to vector<8x256xf32>
    %149 = arith.addf %146, %148 : vector<8x256xf32>
    %cst_61 = arith.constant 5.000000e-01 : f32
    %150 = vector.broadcast %cst_61 : f32 to vector<8x256xf32>
    %151 = arith.mulf %150, %149 : vector<8x256xf32>
    %cst_62 = arith.constant 4.471500e-02 : f32
    %152 = vector.broadcast %cst_62 : f32 to vector<8x256xf32>
    %153 = arith.mulf %152, %149 : vector<8x256xf32>
    %154 = arith.mulf %153, %149 : vector<8x256xf32>
    %155 = arith.mulf %154, %149 : vector<8x256xf32>
    %156 = arith.addf %149, %155 : vector<8x256xf32>
    %cst_63 = arith.constant 0.797884583 : f32
    %157 = vector.broadcast %cst_63 : f32 to vector<8x256xf32>
    %158 = arith.mulf %157, %156 : vector<8x256xf32>
    %159 = math.tanh %158 : vector<8x256xf32>
    %cst_64 = arith.constant 1.000000e+00 : f32
    %160 = vector.broadcast %cst_64 : f32 to vector<8x256xf32>
    %161 = arith.addf %160, %159 : vector<8x256xf32>
    %162 = arith.mulf %151, %161 : vector<8x256xf32>
    %163 = arith.truncf %162 : vector<8x256xf32> to vector<8x256xbf16>
    %c0_65 = arith.constant 0 : index
    %c0_66 = arith.constant 0 : index
    %164 = vector.load %arg13[%c0_65, %c0_66] : memref<256x64xbf16, #tpu.memory_space<vmem>>, vector<256x64xbf16>
    %cst_67 = arith.constant dense<0.000000e+00> : vector<8x64xf32>
    %165 = tpu.matmul %163, %164, %cst_67 {dimension_numbers = #tpu.dot_dimension_numbers<[1], [0], [0], [1], [0, 0, 1, 1], [], []>} : vector<8x256xbf16>, vector<256x64xbf16>, vector<8x64xf32> -> vector<8x64xf32>
    %c0_68 = arith.constant 0 : index
    %c0_69 = arith.constant 0 : index
    %166 = vector.load %arg14[%c0_68, %c0_69] : memref<1x64xf32, #tpu.memory_space<vmem>>, vector<1x64xf32>
    %167 = vector.broadcast %166 : vector<1x64xf32> to vector<8x64xf32>
    %168 = arith.addf %165, %167 : vector<8x64xf32>
    %169 = arith.addf %121, %168 : vector<8x64xf32>
    %c0_70 = arith.constant 0 : index
    %c0_71 = arith.constant 0 : index
    %170 = vector.load %arg15[%c0_70, %c0_71] : memref<8x64xf32, #tpu.memory_space<vmem>>, vector<8x64xf32>
    tpu.vector_store %arg15[%c0_70, %c0_71], %169 {strides = array<i32>} : memref<8x64xf32, #tpu.memory_space<vmem>>, vector<8x64xf32>,
    return
  }
  func.func @transform_0(%arg0: i32) -> (i32, i32, i32) {
    %c0_i32 = arith.constant 0 : i32
    %c0_i32_0 = arith.constant 0 : i32
    %c0_i32_1 = arith.constant 0 : i32
    return %arg0, %c0_i32, %c0_i32_0 : i32, i32, i32
  }
  func.func @transform_1(%arg0: i32) -> (i32, i32) {
    %c0_i32 = arith.constant 0 : i32
    %c0_i32_0 = arith.constant 0 : i32
    return %arg0, %c0_i32 : i32, i32
  }
  func.func @transform_2(%arg0: i32) -> (i32, i32) {
    %c0_i32 = arith.constant 0 : i32
    %c0_i32_0 = arith.constant 0 : i32
    %c0_i32_1 = arith.constant 0 : i32
    return %c0_i32, %c0_i32_0 : i32, i32
  }
  func.func @transform_3(%arg0: i32) -> (i32, i32) {
    %c0_i32 = arith.constant 0 : i32
    %c0_i32_0 = arith.constant 0 : i32
    %c0_i32_1 = arith.constant 0 : i32
    return %c0_i32, %c0_i32_0 : i32, i32
  }
  func.func @transform_4(%arg0: i32) -> (i32, i32) {
    %c0_i32 = arith.constant 0 : i32
    %c0_i32_0 = arith.constant 0 : i32
    %c0_i32_1 = arith.constant 0 : i32
    return %c0_i32, %c0_i32_0 : i32, i32
  }
  func.func @transform_5(%arg0: i32) -> (i32, i32) {
    %c0_i32 = arith.constant 0 : i32
    %c0_i32_0 = arith.constant 0 : i32
    %c0_i32_1 = arith.constant 0 : i32
    return %c0_i32, %c0_i32_0 : i32, i32
  }
  func.func @transform_6(%arg0: i32) -> (i32, i32) {
    %c0_i32 = arith.constant 0 : i32
    %c0_i32_0 = arith.constant 0 : i32
    %c0_i32_1 = arith.constant 0 : i32
    return %c0_i32, %c0_i32_0 : i32, i32
  }
  func.func @transform_7(%arg0: i32) -> (i32, i32) {
    %c0_i32 = arith.constant 0 : i32
    %c0_i32_0 = arith.constant 0 : i32
    %c0_i32_1 = arith.constant 0 : i32
    return %c0_i32, %c0_i32_0 : i32, i32
  }
  func.func @transform_8(%arg0: i32) -> (i32, i32) {
    %c0_i32 = arith.constant 0 : i32
    %c0_i32_0 = arith.constant 0 : i32
    %c0_i32_1 = arith.constant 0 : i32
    return %c0_i32, %c0_i32_0 : i32, i32
  }
  func.func @transform_9(%arg0: i32) -> (i32, i32) {
    %c0_i32 = arith.constant 0 : i32
    %c0_i32_0 = arith.constant 0 : i32
    %c0_i32_1 = arith.constant 0 : i32
    return %c0_i32, %c0_i32_0 : i32, i32
  }
  func.func @transform_10(%arg0: i32) -> (i32, i32) {
    %c0_i32 = arith.constant 0 : i32
    %c0_i32_0 = arith.constant 0 : i32
    %c0_i32_1 = arith.constant 0 : i32
    return %c0_i32, %c0_i32_0 : i32, i32
  }
  func.func @transform_11(%arg0: i32) -> (i32, i32) {
    %c0_i32 = arith.constant 0 : i32
    %c0_i32_0 = arith.constant 0 : i32
    %c0_i32_1 = arith.constant 0 : i32
    return %c0_i32, %c0_i32_0 : i32, i32
  }
  func.func @transform_12(%arg0: i32) -> (i32, i32) {
    %c0_i32 = arith.constant 0 : i32
    %c0_i32_0 = arith.constant 0 : i32
    %c0_i32_1 = arith.constant 0 : i32
    return %c0_i32, %c0_i32_0 : i32, i32
  }
  func.func @transform_13(%arg0: i32) -> (i32, i32) {
    %c0_i32 = arith.constant 0 : i32
    %c0_i32_0 = arith.constant 0 : i32
    %c0_i32_1 = arith.constant 0 : i32
    return %c0_i32, %c0_i32_0 : i32, i32
  }
  func.func @transform_14(%arg0: i32) -> (i32, i32) {
    %c0_i32 = arith.constant 0 : i32
    %c0_i32_0 = arith.constant 0 : i32
    return %arg0, %c0_i32 : i32, i32
  }
}

</mosaic_0001>

<bundles_post_ra>
// kernel: gpt2_forward.5
= control target key start
LH: loop header
LB: loop body
LE: loop exit
PB: predicated region body
PF: predicated region fallthrough
CT: control target
= control target key end

     0   :  { %s705_s15 = smov 0   ;;  %s707_s16 = smov 0   ;;  %s809_s0 = inlined_call_operand.vmem [shape: f32[16,64], index: 0, kind: input, shape index: {}]   ;;  %s810_s1 = inlined_call_operand.vmem [shape: f32[1,64], index: 1, kind: input, shape index: {}]   ;;  %s811_s2 = inlined_call_operand.vmem [shape: f32[1,64], index: 2, kind: input, shape index: {}]   ;;  %s812_s3 = inlined_call_operand.vmem [shape: bf16[256,64], index: 3, kind: input, shape index: {}]   ;;  %s813_s4 = inlined_call_operand.vmem [shape: f32[16,256], index: 4, kind: output, shape index: {}]  }
   0x1   :  { %s709_s17 = smov 0   ;;  %s711_s18 = smov 0  }
   0x2   :  { %s713_s19 = smov 0  }
   0x3 LB: > { %s531_s20 = sadd.s32 4294967295, %s676_s19   ;;  %s23_s21 = sadd.s32 1, %s672_s18  ;;  %s676_s19 = sphi %s713_s19, %s14_s19   ;;  %s672_s18 = sphi %s711_s18, %s818_s18   ;;  %s668_s17 = sphi %s709_s17, %s817_s17   ;;  %s664_s16 = sphi %s707_s16, %s816_s16   ;;  %s660_s15 = sphi %s705_s15, %s815_s15  }
   0x4   : > { %p24_p0 = scmp.ge.s32.totalorder %s23_s21, 2  ;;  %s129_s22 = sadd.s32 1, %s664_s16 }
   0x5   : > { %p139_p1 = scmp.ne.s32.totalorder %s664_s16, %s660_s15  ;;  %p140_p2 = scmp.eq.s32.totalorder %s531_s20, 1 }
   0x6   : > { %s820_s21 = smov (%p24_p0, %s23_s21), 0  ;;  %p536_p4 = scmp.ge.s32.totalorder %s676_s19, 1 }
   0x7   : > { %p737_p3 = por %p140_p2, %p139_p1  ;;  %s125_s24 = ssub.s32 %s672_s18, %s820_s21 }
   0x8   : > { %p188_p5 = scmp.lt.s32.totalorder %s676_s19, 3  ;;  %p127_p6 = scmp.eq.s32.totalorder %s125_s24, 0 }
   0xa   : > { %p189_p7 = pnand %p536_p4, %p188_p5 }
   0xb   : > { %s746_s25 = scalar_select %p127_p6, %s664_s16, %s129_s22  }
   0xc   : > { %192 = sbr.rel (%p189_p7) target bundleno = 555 (0x22b), region = 36  ;;  %v232_v0 = vld [vmem:[%s809_s0] sm:$0xff] (!%p189_p7)  ;;  %vm236_vm0 = vcmask (!%p189_p7), 523264   ;;  %v233_v1 = vld [vmem:[%s809_s0 + $0x8] sm:$0xff] (!%p189_p7)  ;;  %s538_s30 = sshll.u32 (!%p189_p7), %s668_s17, 4  ;;  %v678_v4 = vmov (!%p189_p7), 0.0  }
   0xd   : > { %v237_v2 = vsel (!%p189_p7), %vm236_vm0, %v232_v0, 0.0  ;;  %v240_v3 = vsel (!%p189_p7), %vm236_vm0, %v233_v1, 0.0  ;;  %564 = vmatprep.subr.bf16.mxu0 (!%p189_p7), %v678_v4  ;;  %p225_p8 = scmp.lt.s32.totalorder (!%p189_p7), %s538_s30, 31  ;;  %vm679_vm1 = vmmov (!%p189_p7), 0   ;;  %v540_v39 = vld [vmem:[%s810_s1] ss:$0 sm:$0xff] (!%p189_p7) }
   0xe   : > { %238 = vadd.xlane.f32.xlu0 (!%p189_p7), %v237_v2  ;;  %580 = vmatprep.mubr.msk.bf16.mxu0 (!%p189_p7), %vm679_vm1, %v678_v4  ;;  %v541_v43 = vld [vmem:[%s811_s2] ss:$0 sm:$0xff] (!%p189_p7)  ;;  %s215_s13 = sand.u32 (!%p189_p7), 1, %s660_s15  }
   0xf   : > { %s537_s14 = sshll.u32 (!%p189_p7), %s215_s13, 4 }
  0x10   : > { %s217_s20 = scalar_lea.vmem (!%p189_p7), [#allocation2], %s537_s14 }
  0x12   : > { %241 = vadd.xlane.f32.xlu0 (!%p189_p7), %v240_v3 }
  0x13   : > { %s822_s30 = smov (!%p225_p8, %s538_s30), 31  ;;  %s552_s22 = sshll.u32 (%p737_p3), %s668_s17, 3 }
  0x14   : > { %s539_s5 = sshll.u32 %s822_s30, 2  ;;  %s418_s27 = scalar_lea.vmem (%p737_p3), %s813_s4, %s552_s22 }
  0x15   : > { %s760_s8 = scalar_lea.vmem %s812_s3, %s539_s5 }
  0x16   : > { %v626_v5 = vld [vmem:[%s760_s8] sm:$0xff]   ;;  %v627_v7 = vld [vmem:[%s760_s8 + $0x8] sm:$0xff]   ;;  %v628_v9 = vld [vmem:[%s760_s8 + $0x10] sm:$0xff]  }
  0x17   : > { %v341_v6 = vsel %vm236_vm0, %v626_v5, 0  ;;  %v344_v8 = vsel %vm236_vm0, %v627_v7, 0  ;;  %v347_v10 = vsel %vm236_vm0, %v628_v9, 0  ;;  %v629_v11 = vld [vmem:[%s760_s8 + $0x18] sm:$0xff]   ;;  %v630_v13 = vld [vmem:[%s760_s8 + $0x20] sm:$0xff]   ;;  %v631_v25 = vld [vmem:[%s760_s8 + $0x28] sm:$0xff]  }
  0x18   : > { %565 = vmatpush3.bf16.xpose.msra.mxu0 %v341_v6  ;;  %v350_v12 = vsel %vm236_vm0, %v629_v11, 0  ;;  %v353_v14 = vsel %vm236_vm0, %v630_v13, 0  ;;  %v356_v26 = vsel %vm236_vm0, %v631_v25, 0  ;;  %v632_v27 = vld [vmem:[%s760_s8 + $0x30] sm:$0xff]   ;;  %v633_v29 = vld [vmem:[%s760_s8 + $0x38] sm:$0xff]  }
  0x19   : > { %566 = vmatprep.subr.bf16.mxu0 %v678_v4  ;;  %v359_v28 = vsel %vm236_vm0, %v632_v27, 0  ;;  %v362_v30 = vsel %vm236_vm0, %v633_v29, 0 }
  0x20   : > { %567 = vmatpush3.bf16.xpose.msra.mxu0 %v344_v8 }
  0x21   : > { %568 = vmatprep.subr.bf16.mxu0 %v678_v4 }
  0x28   : > { %569 = vmatpush3.bf16.xpose.msra.mxu0 %v347_v10 }
  0x29   : > { %570 = vmatprep.subr.bf16.mxu0 %v678_v4 }
  0x30   : > { %571 = vmatpush3.bf16.xpose.msra.mxu0 %v350_v12 }
  0x31   : > { %572 = vmatprep.subr.bf16.mxu0 %v678_v4 }
  0x38   : > { %573 = vmatpush3.bf16.xpose.msra.mxu0 %v353_v14 }
  0x39   : > { %574 = vmatprep.subr.bf16.mxu0 %v678_v4 }
  0x40   : > { %575 = vmatpush3.bf16.xpose.msra.mxu0 %v356_v26 }
  0x41   : > { %576 = vmatprep.subr.bf16.mxu0 %v678_v4 }
  0x48   : > { %577 = vmatpush3.bf16.xpose.msra.mxu0 %v359_v28 }
  0x49   : > { %578 = vmatprep.subr.bf16.mxu0 %v678_v4 }
  0x50   : > { %579 = vmatpush3.bf16.xpose.msra.mxu0 %v362_v30 }
  0x9b   : > { %v239_v15 = vpop.xlane.xlu0 %238 }
  0x9c   : > { %v244_v16 = vmul.f32 0.015625, %v239_v15 }
  0x9e   : > { %v246_v17 = vsub.f32 %v232_v0, %v244_v16 }
  0x9f   : > { %v242_v18 = vpop.xlane.xlu0 %241 }
  0xa0   : > { %v245_v19 = vmul.f32 0.015625, %v242_v18  ;;  %v248_v20 = vmul.f32 %v246_v17, %v246_v17 }
  0xa2   : > { %v247_v21 = vsub.f32 %v233_v1, %v245_v19  ;;  %v250_v22 = vsel %vm236_vm0, %v248_v20, 0.0 }
  0xa3   : > { %251 = vadd.xlane.f32.xlu1 %v250_v22 }
  0xa4   : > { %v249_v23 = vmul.f32 %v247_v21, %v247_v21 }
  0xa6   : > { %v253_v24 = vsel %vm236_vm0, %v249_v23, 0.0 }
  0xa7   : > { %254 = vadd.xlane.f32.xlu1 %v253_v24 }
 0x130   : > { %v252_v31 = vpop.xlane.xlu1 %251 }
 0x131   : > { %v256_v32 = vmul.f32 0.015625, %v252_v31 }
 0x133   : > { %v258_v33 = vadd.f32 1e-05, %v256_v32 }
 0x134   : > { %v255_v34 = vpop.xlane.xlu1 %254 }
 0x135   : > { %634 = vrsqrt.f32 %v258_v33  ;;  %v257_v35 = vmul.f32 0.015625, %v255_v34 }
 0x137   : > { %v259_v36 = vadd.f32 1e-05, %v257_v35 }
 0x139   : > { %636 = vrsqrt.f32 %v259_v36 }
 0x13f   : > { %v635_v37 = vpop.eup %634 }
 0x140   : > { %v262_v38 = vmul.f32 %v635_v37, %v246_v17 }
 0x142   : > { %v270_v42 = vmul.f32 %v540_v39, %v262_v38 }
 0x143   : > { %v637_v40 = vpop.eup %636 }
 0x144   : > { %v263_v41 = vmul.f32 %v637_v40, %v247_v21  ;;  %v278_v45 = vadd.f32 %v541_v43, %v270_v42 }
 0x146   : > { %v271_v44 = vmul.f32 %v540_v39, %v263_v41 }
 0x148   : > { %v279_v46 = vadd.f32 %v541_v43, %v271_v44 }
 0x14a   : > { %v280_v47 = vpack.c.bf16 %v279_v46, %v278_v45 }
 0x14c   : > { %581 = vmatmul.mubr.msk.bf16.vlgmr.msra.gmra.mrb[0].mxu0 %vm236_vm0, %v280_v47 }
 0x21c   : > { %413 = sbr.rel (!%p737_p3) target bundleno = 555 (0x22b), region = 40 }
 0x21f   : > { %v398_v48 = vpop.f32.mrb[0].mxu0 }
 0x220   : > { %405 = vst [vmem:[%s217_s20] sm:$0xff] %v398_v48  ;;  %v582_v49 = vpop.f32.mrb[1].mxu0 }
 0x221   : > { %v401_v50 = vpop.f32.mrb[2].mxu0 }
 0x222   : > { %406 = vst [vmem:[%s217_s20 + $0x8] sm:$0xff] %v401_v50  ;;  %v583_v51 = vpop.f32.mrb[3].mxu0 }
 0x227   : > { %v448_v52 = vld [vmem:[%s217_s20] sm:$0xff] }
 0x228   : > { %449 = vst [vmem:[%s418_s27] sm:$0xff] %v448_v52 }
 0x229   : > { %v450_v53 = vld [vmem:[%s217_s20 + $0x8] sm:$0xff] }
 0x22a   : > { %451 = vst [vmem:[%s418_s27 + $0x10] sm:$0xff] %v450_v53 }
 0x22b PF: > { %s14_s19 = sadd.s32 1, %s676_s19   ;;  %s815_s15 = smov %s664_s16 }
 0x22c   : > { %p11_p9 = scmp.ge.s32.totalorder %s14_s19, 4   ;;  %s816_s16 = smov %s746_s25 }
 0x22d   : > { %s817_s17 = smov %s672_s18  ;;  %s818_s18 = smov %s820_s21 }
 0x22e   :  { %13 = sbr.rel (!%p11_p9) target bundleno = 3 (0x3), region = 107 }

// kernel: gpt2_forward.3
= control target key start
LH: loop header
LB: loop body
LE: loop exit
PB: predicated region body
PF: predicated region fallthrough
CT: control target
= control target key end

     0   :  { %s2130_s29 = smov 0   ;;  %s2417_s0 = inlined_call_operand.vmem [shape: f32[2,1,8], index: 0, kind: input, shape index: {}]   ;;  %s2418_s1 = inlined_call_operand.vmem [shape: f32[16,64], index: 1, kind: input, shape index: {}]   ;;  %s2419_s2 = inlined_call_operand.vmem [shape: f32[1,64], index: 2, kind: input, shape index: {}]   ;;  %s2420_s3 = inlined_call_operand.vmem [shape: f32[1,64], index: 3, kind: input, shape index: {}]   ;;  %s2421_s4 = inlined_call_operand.vmem [shape: bf16[64,192], index: 4, kind: input, shape index: {}]   ;;  %s2422_s5 = inlined_call_operand.vmem [shape: f32[1,192], index: 5, kind: input, shape index: {}]   ;;  %s2423_s6 = inlined_call_operand.vmem [shape: bf16[64,64], index: 6, kind: input, shape index: {}]   ;;  %s2424_s7 = inlined_call_operand.vmem [shape: f32[1,64], index: 7, kind: input, shape index: {}]   ;;  %s2425_s8 = inlined_call_operand.vmem [shape: f32[1,64], index: 8, kind: input, shape index: {}]   ;;  %s2426_s9 = inlined_call_operand.vmem [shape: f32[1,64], index: 9, kind: input, shape index: {}]   ;;  %s2427_s10 = inlined_call_operand.vmem [shape: bf16[64,256], index: 10, kind: input, shape index: {}]   ;;  %s2428_s11 = inlined_call_operand.vmem [shape: f32[1,256], index: 11, kind: input, shape index: {}]   ;;  %s2429_s12 = inlined_call_operand.vmem [shape: bf16[256,64], index: 12, kind: input, shape index: {}]   ;;  %s2430_s13 = inlined_call_operand.vmem [shape: f32[1,64], index: 13, kind: input, shape index: {}]   ;;  %s2431_s14 = inlined_call_operand.vmem [shape: f32[16,64], index: 14, kind: output, shape index: {}]  }
   0x1 LB: > { %s1790_s30 = sadd.s32 4294967295, %s2043_s29   ;;  %p1794_p0 = scmp.ge.s32.totalorder %s2043_s29, 1  ;;  %s2043_s29 = sphi %s2130_s29, %s24_s29  }
   0x2   : > { %p419_p1 = scmp.lt.s32.totalorder %s2043_s29, 3 }
   0x4   : > { %p420_p2 = pnand %p1794_p0, %p419_p1 }
   0x5   : > { %p466_p3 = scmp.lt.s32.totalorder (!%p420_p2), %s1790_s30, 1  ;;  %vm481_vm0 = vcmask (!%p420_p2), 523264   ;;  %v1969_v7 = vld [vmem:[%s2421_s4 + $0x4] ss:$8 sps:$4 sm:$0xff] (!%p420_p2)   ;;  %v1971_v8 = vld [vmem:[%s2421_s4] ss:$8 sps:$4 sm:$0xff] (!%p420_p2)   ;;  %v521_v27 = vlaneseq (!%p420_p2) }
   0x6   : > { %423 = sbr.rel (%p420_p2) target bundleno = 3587 (0xe03), region = 76  ;;  %v1972_v9 = vld [vmem:[%s2421_s4 + $0x14] ss:$8 sps:$4 sm:$0xff] (!%p420_p2)   ;;  %574 = vmatprep.subr.bf16.mxu0 (!%p420_p2), %v1969_v7  ;;  %v1974_v10 = vld [vmem:[%s2421_s4 + $0x10] ss:$8 sps:$4 sm:$0xff] (!%p420_p2)   ;;  %v2045_v11 = vmov (!%p420_p2), 0  }
   0x7   : > { %575 = vmatpush1.bf16.msra.mxu0 (!%p420_p2), %v1971_v8  ;;  %606 = vmatprep.mubr.bf16.mxu0 (!%p420_p2), %v2045_v11  ;;  %v1975_v12 = vld [vmem:[%s2421_s4 + $0x24] ss:$8 sps:$4 sm:$0xff] (!%p420_p2)   ;;  %v1977_v13 = vld [vmem:[%s2421_s4 + $0x20] ss:$8 sps:$4 sm:$0xff] (!%p420_p2)   ;;  %v1978_v14 = vld [vmem:[%s2421_s4 + $0x34] ss:$8 sps:$4 sm:$0xff] (!%p420_p2)  }
   0x8   : > { %576 = vmatprep.subr.bf16.mxu0 (!%p420_p2), %v1972_v9  ;;  %v1980_v15 = vld [vmem:[%s2421_s4 + $0x30] ss:$8 sps:$4 sm:$0xff] (!%p420_p2)   ;;  %v1797_v20 = vld [vmem:[%s2419_s2] ss:$0 sm:$0xff] (!%p420_p2)  ;;  %v2046_v26 = vmov (!%p420_p2), 0.0   ;;  %v2186_v28 = vshrl.u32 (!%p420_p2), %v521_v27, 7 }
   0x9   : > { %v1798_v22 = vld [vmem:[%s2420_s3] ss:$0 sm:$0xff] (!%p420_p2)  ;;  %1899 = vmatprep.subr.mxu1 (!%p420_p2), %v2046_v26  ;;  %vm2047_vm1 = vmmov (!%p420_p2), 0   ;;  %s2048_s28 = smov (!%p420_p2), 48   ;;  %s2049_s16 = smov (!%p420_p2), 64   ;;  %vm632_vm2 = vcmask (!%p420_p2), 130048  }
   0xa   : > { %1901 = vmatprep.mubr.msk.f32.mxu1 (!%p420_p2), %vm2047_vm1, %v2046_v26  ;;  %v2193_v29 = vsub.s32 (!%p420_p2), 0, %v2186_v28  ;;  %v519_v30 = vld [vmem:[%s2422_s5] sm:$0x3] (!%p420_p2)  ;;  %v527_v37 = vsub.s32 (!%p420_p2), 1, %v2186_v28  ;;  %v618_v44 = vand.u32 (!%p420_p2), 127, %v521_v27  ;;  %vm709_vm7 = vcmask (!%p420_p2), 64512  }
   0xb   : > { %577 = vmatpush1.bf16.msra.mxu0 (!%p420_p2), %v1974_v10  ;;  %s2050_s20 = smov (!%p420_p2), 112   ;;  %s2051_s21 = smov (!%p420_p2), 32   ;;  %vm1309_vm8 = vcmask (!%p420_p2), 261120   ;;  %vm1311_vm9 = vcmask (!%p420_p2), 392192  }
   0xc   : > { %578 = vmatprep.subr.bf16.mxu0 (!%p420_p2), %v1975_v12  ;;  %v524_v31 = vrot.slane (!%p420_p2), %v519_v30, %v2193_v29  ;;  %v528_v38 = vrot.slane (!%p420_p2), %v519_v30, %v527_v37  ;;  %vm621_vm5 = vcmp.le.s32.totalorder (!%p420_p2), %v618_v44, %v2186_v28  ;;  %s2052_s22 = smov (!%p420_p2), 96   ;;  %s2053_s23 = smov (!%p420_p2), 16  }
   0xd   : > { %s2435_s30 = smov (!%p466_p3, %s1790_s30), 1  ;;  %s2054_s24 = smov 80  }
   0xe   : > { %s1795_s15 = sshll.u32 %s2435_s30, 3  ;;  %s468_s19 = scalar_lea.vmem %s2417_s0, %s2435_s30 }
   0xf   : > { %s472_s18 = scalar_lea.vmem %s2418_s1, %s1795_s15  ;;  %579 = vmatpush1.bf16.msra.mxu0 %v1977_v13  ;;  %v619_v41 = vld [vmem:[%s468_s19] sm:$0x1] }
  0x10   : > { %v2146_v0 = vld [vmem:[%s472_s18] sm:$0xff]  ;;  %580 = vmatprep.subr.bf16.mxu0 %v1978_v14  ;;  %vm620_vm3 = vcmp.gt.f32.partialorder %v619_v41, 0.0 }
  0x11   : > { %v482_v1 = vsel %vm481_vm0, %v2146_v0, 0.0  ;;  %v622_v42 = vsel %vm620_vm3, 1, %v2045_v11 }
  0x12   : > { %483 = vadd.xlane.f32.xlu0 %v482_v1  ;;  %v626_v43 = vrot.slane %v622_v42, %v2193_v29 }
  0x13   : > { %581 = vmatpush1.bf16.msra.mxu0 %v1980_v15 }
  0x14   : > { %1924 = vmatprep.subr.mxu0 %v2046_v26  ;;  %vm627_vm4 = vcmp.eq.s32.totalorder %v626_v43, 1 }
  0x15   : > { %vm2224_vm6 = vmand %vm621_vm5, %vm627_vm4 }
  0x9f   : > { %v484_v2 = vpop.xlane.xlu0 %483 }
  0xa0   : > { %v486_v3 = vmul.f32 0.015625, %v484_v2 }
  0xa2   : > { %v487_v4 = vsub.f32 %v2146_v0, %v486_v3 }
  0xa4   : > { %v488_v5 = vmul.f32 %v487_v4, %v487_v4 }
  0xa6   : > { %v489_v6 = vsel %vm481_vm0, %v488_v5, 0.0 }
  0xa7   : > { %490 = vadd.xlane.f32.xlu0 %v489_v6 }
 0x134   : > { %v491_v16 = vpop.xlane.xlu0 %490 }
 0x135   : > { %v492_v17 = vmul.f32 0.015625, %v491_v16 }
 0x137   : > { %v493_v18 = vadd.f32 1e-05, %v492_v17 }
 0x139   : > { %2013 = vrsqrt.f32 %v493_v18 }
 0x143   : > { %v2014_v19 = vpop.eup %2013 }
 0x144   : > { %v495_v21 = vmul.f32 %v2014_v19, %v487_v4 }
 0x146   : > { %v502_v23 = vmul.f32 %v1797_v20, %v495_v21 }
 0x148   : > { %v509_v24 = vadd.f32 %v1798_v22, %v502_v23 }
 0x14a   : > { %v510_v25 = vpack.c.bf16 %v509_v24, %v509_v24 }
 0x14c   : > { %1807 = vmatmul.mubr.msk.bf16.vlgmr.msra.gmra.mrb[0].mxu0 %vm481_vm0, %v510_v25 }
 0x14d   : > { %1926 = vmatprep.mubr.msk.f32.mxu0 %vm2047_vm1, %v2046_v26 }
 0x21f   : > { %v608_v32 = vpop.f32.mrb[0].mxu0 }
 0x220   : > { %v2199_v33 = vadd.f32 %v608_v32, %v524_v31  ;;  %v610_v34 = vpop.f32.mrb[1].mxu0 }
 0x221   : > { %v612_v35 = vpop.f32.mrb[2].mxu0  ;;  %v2209_v40 = vadd.f32 %v610_v34, %v528_v38 }
 0x222   : > { %v613_v36 = vpop.f32.mrb[3].mxu0  ;;  %796 = vrot.lane.b32.xlu0 %v2199_v33, %s2048_s28  ;;  %630 = vrot.lane.b32.xlu1 %v2199_v33, %s2049_s16  ;;  %s476_s16 = scalar_lea.vmem %s2431_s14, %s1795_s15 }
 0x294   : > { %v631_v39 = vpop.permute.xlu1 %630  ;;  %v797_v56 = vpop.permute.xlu0 %796 }
 0x295   : > { %1900 = vmatpush3.xpose.msk.msra.mxu1 %vm632_vm2, %v631_v39 }
 0x296   : > { %1904 = vmatprep.subr.mxu1 %v2046_v26 }
 0x298   : > { %1902 = vmatmul.mubr.msk.f32.vlgmr.msra.gmra.mrb[0].mxu1 %vm632_vm2, %v2199_v33 }
 0x299   : > { %1905 = vmatpush3.msra.mxu1 %v2209_v40  ;;  %1906 = vmatprep.mubr.msk.f32.mxu1 %vm2047_vm1, %v2046_v26 }
 0x29a   : > { %1909 = vmatprep.subr.mxu1 %v2046_v26 }
 0x36b   : > { %v703_v45 = vpop.f32.mrb[0].mxu1 }
 0x36c   : > { %v707_v47 = vmul.f32 0.25, %v703_v45  ;;  %v1903_v48 = vpop.f32.mrb[1].mxu1 }
 0x36e   : > { %v708_v49 = vsel %vm2224_vm6, %v707_v47, -1e+09 }
 0x36f   : > { %v710_v50 = vsel %vm709_vm7, %v708_v49, -inf }
 0x370   : > { %711 = vmax.xlane.f32.xlu1 %v710_v50 }
 0x381   : > { %886 = vrot.lane.b32.xlu1 %v2209_v40, %s2050_s20 }
 0x385   : > { %964 = vrot.lane.b32.xlu1 %v2199_v33, %s2051_s21 }
 0x389   : > { %962 = vrot.lane.b32.xlu1 %v2199_v33, %s2052_s22 }
 0x3fd   : > { %v712_v51 = vpop.xlane.xlu1 %711 }
 0x3fe   : > { %v713_v52 = vsub.f32 %v708_v49, %v712_v51 }
 0x400   : > { %v714_v53 = vmul.f32 1.442695, %v713_v52 }
 0x401   : > { %v887_v61 = vpop.permute.xlu1 %886 }
 0x402   : > { %2015 = vpow2.f32 %v714_v53  ;;  %v1981_v53 = vld [vmem:[%s2423_s6] sm:$0xff]  }
 0x405   : > { %v965_v12 = vpop.permute.xlu1 %964 }
 0x409   : > { %v963_v13 = vpop.permute.xlu1 %962 }
 0x40c   : > { %v2016_v54 = vpop.eup %2015 }
 0x40d   : > { %v716_v55 = vsel %vm709_vm7, %v2016_v54, 0.0 }
 0x40e   : > { %717 = vadd.xlane.f32.xlu0 %v716_v55  ;;  %v1983_v55 = vld [vmem:[%s2423_s6 + $0x10] sm:$0xff]  }
 0x424   : > { %794 = vrot.lane.b32.xlu0 %v2199_v33, %s2050_s20 }
 0x49b   : > { %v718_v57 = vpop.xlane.xlu0 %717 }
 0x49c   : > { %2017 = vrcp.f32 %v718_v57 }
 0x49f   : > { %v795_v60 = vpop.permute.xlu0 %794 }
 0x4a6   : > { %v2018_v58 = vpop.eup %2017 }
 0x4a7   : > { %v720_v59 = vmul.f32 %v2018_v58, %v2016_v54  ;;  %v1982_v54 = vld [vmem:[%s2423_s6 + $0x8] sm:$0xff]  }
 0x4a9   : > { %1907 = vmatmul.mubr.msk.f32.vlgmr.msra.gmra.mrb[2].mxu1 %vm709_vm7, %v720_v59 }
 0x4aa   : > { %1910 = vmatpush3.xpose.msk.msra.mxu1 %vm632_vm2, %v797_v56  ;;  %1911 = vmatprep.mubr.msk.f32.mxu1 %vm2047_vm1, %v2046_v26  ;;  %v1984_v56 = vld [vmem:[%s2423_s6 + $0x18] sm:$0xff]  }
 0x4ab   : > { %1914 = vmatprep.subr.mxu1 %v2046_v26 }
 0x4ad   : > { %1912 = vmatmul.mubr.msk.f32.vlgmr.msra.gmra.mrb[4].mxu1 %vm632_vm2, %v795_v60 }
 0x4ae   : > { %1915 = vmatpush3.msra.mxu1 %v887_v61  ;;  %1916 = vmatprep.mubr.msk.f32.mxu1 %vm2047_vm1, %v2046_v26 }
 0x4af   : > { %1919 = vmatprep.subr.mxu1 %v2046_v26 }
 0x57c   : > { %v2247_v62 = vpop.f32.mrb[2].mxu1 }
 0x57d   : > { %v1908_v63 = vpop.f32.mrb[3].mxu1 }
 0x580   : > { %v868_v1 = vpop.f32.mrb[4].mxu1 }
 0x581   : > { %v872_v2 = vmul.f32 0.25, %v868_v1  ;;  %v1913_v3 = vpop.f32.mrb[5].mxu1 }
 0x583   : > { %v873_v4 = vsel %vm2224_vm6, %v872_v2, -1e+09 }
 0x584   : > { %v874_v5 = vsel %vm709_vm7, %v873_v4, -inf }
 0x585   : > { %875 = vmax.xlane.f32.xlu0 %v874_v5  ;;  %v1820_v5 = vld [vmem:[%s2424_s7] ss:$0 sm:$0xff] }
 0x59b   : > { %1131 = vrot.lane.b32.xlu0 %v2199_v33, %s2053_s23 }
 0x612   : > { %v876_v6 = vpop.xlane.xlu0 %875 }
 0x613   : > { %v877_v7 = vsub.f32 %v873_v4, %v876_v6 }
 0x615   : > { %v878_v8 = vmul.f32 1.442695, %v877_v7 }
 0x616   : > { %v1132_v17 = vpop.permute.xlu0 %1131 }
 0x617   : > { %2019 = vpow2.f32 %v878_v8 }
 0x621   : > { %v2020_v9 = vpop.eup %2019 }
 0x622   : > { %v880_v10 = vsel %vm709_vm7, %v2020_v9, 0.0 }
 0x623   : > { %881 = vadd.xlane.f32.xlu1 %v880_v10 }
 0x634   : > { %1129 = vrot.lane.b32.xlu1 %v2199_v33, %s2054_s24 }
 0x6b0   : > { %v882_v14 = vpop.xlane.xlu1 %881 }
 0x6b1   : > { %2021 = vrcp.f32 %v882_v14 }
 0x6b4   : > { %v1130_v18 = vpop.permute.xlu1 %1129 }
 0x6bb   : > { %v2022_v15 = vpop.eup %2021 }
 0x6bc   : > { %v884_v16 = vmul.f32 %v2022_v15, %v2020_v9 }
 0x6be   : > { %1917 = vmatmul.mubr.msk.f32.vlgmr.msra.gmra.mrb[6].mxu1 %vm709_vm7, %v884_v16 }
 0x6bf   : > { %1920 = vmatpush3.xpose.msk.msra.mxu1 %vm632_vm2, %v965_v12  ;;  %1921 = vmatprep.mubr.msk.f32.mxu1 %vm2047_vm1, %v2046_v26 }
 0x6c0   : > { %1929 = vmatprep.subr.mxu1 %v2046_v26 }
 0x6c2   : > { %1922 = vmatmul.mubr.msk.f32.vlgmr.msra.gmra.mrb[8].mxu1 %vm632_vm2, %v963_v13 }
 0x6c3   : > { %1930 = vmatpush3.xpose.msk.msra.mxu1 %vm632_vm2, %v1132_v17  ;;  %1931 = vmatprep.mubr.msk.f32.mxu1 %vm2047_vm1, %v2046_v26  ;;  %v1987_v17 = vld [vmem:[%s2427_s10 + $0x4] ss:$8 sps:$4 sm:$0xff]  }
 0x6c6   : > { %1932 = vmatmul.mubr.msk.f32.vlgmr.msra.gmra.mrb[10].mxu1 %vm632_vm2, %v1130_v18  ;;  %v1990_v18 = vld [vmem:[%s2427_s10 + $0x14] ss:$8 sps:$4 sm:$0xff]  }
 0x791   : > { %v958_v19 = vpop.f32.mrb[6].mxu1 }
 0x792   : > { %v1918_v20 = vpop.f32.mrb[7].mxu1 }
 0x793   : > { %v1993_v20 = vld [vmem:[%s2427_s10 + $0x24] ss:$8 sps:$4 sm:$0xff]  }
 0x795   : > { %v1036_v21 = vpop.f32.mrb[8].mxu1 }
 0x796   : > { %v1040_v22 = vmul.f32 0.25, %v1036_v21  ;;  %v1923_v23 = vpop.f32.mrb[9].mxu1  ;;  %v1991_v21 = vld [vmem:[%s2427_s10 + $0x20] ss:$8 sps:$4 sm:$0xff]  }
 0x797   : > { %v1996_v23 = vld [vmem:[%s2427_s10 + $0x34] ss:$8 sps:$4 sm:$0xff]  }
 0x798   : > { %v1041_v24 = vsel %vm2224_vm6, %v1040_v22, -1e+09  ;;  %v1994_v22 = vld [vmem:[%s2427_s10 + $0x30] ss:$8 sps:$4 sm:$0xff]  }
 0x799   : > { %v1203_v25 = vpop.f32.mrb[10].mxu1  ;;  %v1042_v27 = vsel %vm709_vm7, %v1041_v24, -inf }
 0x79a   : > { %v1207_v30 = vmul.f32 0.25, %v1203_v25  ;;  %1043 = vmax.xlane.f32.xlu1 %v1042_v27  ;;  %v1933_v31 = vpop.f32.mrb[11].mxu1 }
 0x79b   : > { %v1826_v31 = vld [vmem:[%s2425_s8] ss:$0 sm:$0xff] }
 0x79c   : > { %v1208_v32 = vsel %vm2224_vm6, %v1207_v30, -1e+09 }
 0x79d   : > { %v1209_v33 = vsel %vm709_vm7, %v1208_v32, -inf }
 0x79e   : > { %1210 = vmax.xlane.f32.xlu0 %v1209_v33  ;;  %v1827_v33 = vld [vmem:[%s2426_s9] ss:$0 sm:$0xff] }
 0x7b4   : > { %1220 = vrot.lane.b32.xlu0 %v2209_v40, %s2054_s24 }
 0x827   : > { %v1044_v34 = vpop.xlane.xlu1 %1043 }
 0x828   : > { %v1045_v35 = vsub.f32 %v1041_v24, %v1044_v34 }
 0x82a   : > { %v1046_v36 = vmul.f32 1.442695, %v1045_v35 }
 0x82b   : > { %v1211_v38 = vpop.xlane.xlu0 %1210 }
 0x82c   : > { %2023 = vpow2.f32 %v1046_v36  ;;  %v1212_v39 = vsub.f32 %v1208_v32, %v1211_v38  ;;  %v1997_v38 = vld [vmem:[%s2429_s12 + $0x40] sm:$0xff]  }
 0x82d   : > { %1877 = vmatprep.subr.bf16.mxu1 %v1997_v38 }
 0x82e   : > { %v1213_v41 = vmul.f32 1.442695, %v1212_v39  ;;  %v1998_v39 = vld [vmem:[%s2429_s12] sm:$0xff]  }
 0x82f   : > { %v1221_v51 = vpop.permute.xlu0 %1220  ;;  %1878 = vmatpush3.bf16.msra.mxu1 %v1998_v39 }
 0x830   : > { %2025 = vpow2.f32 %v1213_v41  ;;  %v1999_v41 = vld [vmem:[%s2429_s12 + $0x48] sm:$0xff]  }
 0x831   : > { %1879 = vmatprep.subr.bf16.mxu1 %v1999_v41 }
 0x836   : > { %v2024_v42 = vpop.eup %2023 }
 0x837   : > { %v1048_v43 = vsel %vm709_vm7, %v2024_v42, 0.0 }
 0x838   : > { %1049 = vadd.xlane.f32.xlu1 %v1048_v43  ;;  %v2001_v43 = vld [vmem:[%s2429_s12 + $0x50] sm:$0xff]  }
 0x83a   : > { %v2026_v44 = vpop.eup %2025 }
 0x83b   : > { %v1215_v45 = vsel %vm709_vm7, %v2026_v44, 0.0 }
 0x83c   : > { %1216 = vadd.xlane.f32.xlu1 %v1215_v45  ;;  %v2003_v45 = vld [vmem:[%s2429_s12 + $0x58] sm:$0xff]  }
 0x84d   : > { %1053 = vrot.lane.b32.xlu1 %v2209_v40, %s2052_s22 }
 0x851   : > { %1297 = vrot.lane.b32.xlu1 %v958_v19, %s2053_s23  ;;  %v1988_v19 = vld [vmem:[%s2427_s10 + $0x10] ss:$8 sps:$4 sm:$0xff]  }
 0x8c5   : > { %v1050_v46 = vpop.xlane.xlu1 %1049 }
 0x8c6   : > { %2027 = vrcp.f32 %v1050_v46  ;;  %v2004_v46 = vld [vmem:[%s2429_s12 + $0x18] sm:$0xff]  }
 0x8c9   : > { %v1217_v47 = vpop.xlane.xlu1 %1216 }
 0x8ca   : > { %2029 = vrcp.f32 %v1217_v47  ;;  %v2005_v47 = vld [vmem:[%s2429_s12 + $0x60] sm:$0xff]  }
 0x8cd   : > { %v1054_v48 = vpop.permute.xlu1 %1053 }
 0x8ce   : > { %1925 = vmatpush3.msra.mxu0 %v1054_v48  ;;  %v2006_v48 = vld [vmem:[%s2429_s12 + $0x20] sm:$0xff]  }
 0x8cf   : > { %1934 = vmatprep.subr.mxu0 %v2046_v26 }
 0x8d0   : > { %v2028_v49 = vpop.eup %2027 }
 0x8d1   : > { %v1052_v50 = vmul.f32 %v2028_v49, %v2024_v42  ;;  %v1298_v61 = vpop.permute.xlu1 %1297  ;;  %v2000_v42 = vld [vmem:[%s2429_s12 + $0x8] sm:$0xff]  }
 0x8d2   : > { %1880 = vmatpush3.bf16.msra.mxu1 %v2000_v42  ;;  %v2007_v49 = vld [vmem:[%s2429_s12 + $0x68] sm:$0xff]  }
 0x8d3   : > { %1927 = vmatmul.mubr.msk.f32.vlgmr.msra.gmra.mrb[4].mxu0 %vm709_vm7, %v1052_v50  ;;  %1881 = vmatprep.subr.bf16.mxu1 %v2001_v43  ;;  %v2008_v50 = vld [vmem:[%s2429_s12 + $0x28] sm:$0xff]  }
 0x8d4   : > { %v2030_v52 = vpop.eup %2029  ;;  %1935 = vmatpush3.msra.mxu0 %v1221_v51  ;;  %1936 = vmatprep.mubr.msk.f32.mxu0 %vm2047_vm1, %v2046_v26  ;;  %v2009_v51 = vld [vmem:[%s2429_s12 + $0x70] sm:$0xff]  }
 0x8d5   : > { %v1219_v40 = vmul.f32 %v2030_v52, %v2026_v44  ;;  %1939 = vmatprep.subr.bf16.mxu0 %v2046_v26  ;;  %v2002_v44 = vld [vmem:[%s2429_s12 + $0x10] sm:$0xff]  }
 0x8d6   : > { %1882 = vmatpush3.bf16.msra.mxu1 %v2002_v44  ;;  %v2010_v52 = vld [vmem:[%s2429_s12 + $0x30] sm:$0xff]  }
 0x8d7   : > { %1937 = vmatmul.mubr.msk.f32.vlgmr.msra.gmra.mrb[6].mxu0 %vm709_vm7, %v1219_v40  ;;  %1883 = vmatprep.subr.bf16.mxu1 %v2003_v45  ;;  %v2011_v40 = vld [vmem:[%s2429_s12 + $0x78] sm:$0xff]  }
 0x8d8   : > { %1947 = vmatprep.mubr.msk.bf16.mxu0 %vm2047_vm1, %v2046_v26  ;;  %1940 = vmatpush3.bf16.msra.mxu0 %v1981_v53  ;;  %v2012_v53 = vld [vmem:[%s2429_s12 + $0x38] sm:$0xff]  }
 0x8d9   : > { %1941 = vmatprep.subr.bf16.mxu0 %v2046_v26 }
 0x8da   : > { %1884 = vmatpush3.bf16.msra.mxu1 %v2004_v46 }
 0x8db   : > { %1885 = vmatprep.subr.bf16.mxu1 %v2005_v47 }
 0x8dc   : > { %1942 = vmatpush3.bf16.msra.mxu0 %v1982_v54  ;;  %v1435_v54 = vld [vmem:[%s2428_s11] sm:$0x3] }
 0x8dd   : > { %1943 = vmatprep.subr.bf16.mxu0 %v2046_v26 }
 0x8de   : > { %1886 = vmatpush3.bf16.msra.mxu1 %v2006_v48 }
 0x8df   : > { %1887 = vmatprep.subr.bf16.mxu1 %v2007_v49 }
 0x8e0   : > { %1944 = vmatpush3.bf16.msra.mxu0 %v1983_v55  ;;  %v1440_v55 = vrot.slane %v1435_v54, %v2193_v29 }
 0x8e1   : > { %1945 = vmatprep.subr.bf16.mxu0 %v2046_v26  ;;  %v1308_v26 = vsel %vm632_vm2, %v2247_v62, %v1298_v61 }
 0x8e2   : > { %1888 = vmatpush3.bf16.msra.mxu1 %v2008_v50 }
 0x8e3   : > { %1889 = vmatprep.subr.bf16.mxu1 %v2009_v51 }
 0x8e4   : > { %1946 = vmatpush3.bf16.msra.mxu0 %v1984_v56  ;;  %v1444_v56 = vrot.slane %v1435_v54, %v527_v37 }
 0x8e5   : > { %1490 = vmatprep.subr.bf16.mxu0 %v1987_v17 }
 0x8e6   : > { %1890 = vmatpush3.bf16.msra.mxu1 %v2010_v52 }
 0x8e7   : > { %1891 = vmatprep.subr.bf16.mxu1 %v2011_v40 }
 0x8ea   : > { %1892 = vmatpush3.bf16.msra.mxu1 %v2012_v53 }
 0x9a6   : > { %v1125_v57 = vpop.f32.mrb[4].mxu0 }
 0x9a7   : > { %1301 = vrot.lane.b32.xlu1 %v1125_v57, %s2051_s21  ;;  %v1928_v58 = vpop.f32.mrb[5].mxu0 }
 0x9aa   : > { %v1292_v59 = vpop.f32.mrb[6].mxu0 }
 0x9ab   : > { %1305 = vrot.lane.b32.xlu1 %v1292_v59, %s2048_s28  ;;  %v1938_v60 = vpop.f32.mrb[7].mxu0 }
 0xa19   : > { %v1302_v63 = vpop.permute.xlu1 %1301 }
 0xa1a   : > { %v1310_v1 = vsel %vm1309_vm8, %v1308_v26, %v1302_v63 }
 0xa1d   : > { %v1306_v2 = vpop.permute.xlu1 %1305 }
 0xa1e   : > { %v1312_v3 = vsel %vm1311_vm9, %v1310_v1, %v1306_v2 }
 0xa1f   : > { %v1313_v4 = vpack.c.bf16 %v1312_v3, %v1312_v3 }
 0xa21   : > { %1948 = vmatmul.mubr.msk.bf16.vlgmr.msra.gmra.mrb[8].mxu0 %vm481_vm0, %v1313_v4 }
 0xa22   : > { %1522 = vmatprep.mubr.bf16.mxu0 %v2045_v11 }
 0xaf4   : > { %v1390_v6 = vpop.f32.mrb[8].mxu0 }
 0xaf5   : > { %v1391_v7 = vadd.f32 %v1820_v5, %v1390_v6  ;;  %v1949_v8 = vpop.f32.mrb[9].mxu0 }
 0xaf6   : > { %v1393_v9 = vpop.f32.mrb[10].mxu0 }
 0xaf7   : > { %v2313_v10 = vadd.f32 %v1391_v7, %v2146_v0  ;;  %v1950_v62 = vpop.f32.mrb[11].mxu0  ;;  %v1985_v0 = vld [vmem:[%s2427_s10] ss:$8 sps:$4 sm:$0xff]  }
 0xaf8   : > { %1491 = vmatpush1.bf16.msra.mxu0 %v1985_v0  ;;  %v1837_v0 = vld [vmem:[%s2430_s13] ss:$0 sm:$0xff] }
 0xaf9   : > { %v1399_v12 = vsel %vm481_vm0, %v2313_v10, 0.0  ;;  %1492 = vmatprep.subr.bf16.mxu0 %v1990_v18 }
 0xafa   : > { %1400 = vadd.xlane.f32.xlu0 %v1399_v12 }
 0xafc   : > { %1493 = vmatpush1.bf16.msra.mxu0 %v1988_v19 }
 0xafd   : > { %1494 = vmatprep.subr.bf16.mxu0 %v1993_v20 }
 0xb00   : > { %1495 = vmatpush1.bf16.msra.mxu0 %v1991_v21 }
 0xb01   : > { %1496 = vmatprep.subr.bf16.mxu0 %v1996_v23 }
 0xb04   : > { %1497 = vmatpush1.bf16.msra.mxu0 %v1994_v22 }
 0xb87   : > { %v1401_v13 = vpop.xlane.xlu0 %1400 }
 0xb88   : > { %v1402_v14 = vmul.f32 0.015625, %v1401_v13 }
 0xb8a   : > { %v1403_v11 = vsub.f32 %v2313_v10, %v1402_v14 }
 0xb8c   : > { %v1404_v15 = vmul.f32 %v1403_v11, %v1403_v11 }
 0xb8e   : > { %v1405_v16 = vsel %vm481_vm0, %v1404_v15, 0.0 }
 0xb8f   : > { %1406 = vadd.xlane.f32.xlu1 %v1405_v16 }
 0xc1c   : > { %v1407_v24 = vpop.xlane.xlu1 %1406 }
 0xc1d   : > { %v1408_v25 = vmul.f32 0.015625, %v1407_v24 }
 0xc1f   : > { %v1409_v27 = vadd.f32 1e-05, %v1408_v25 }
 0xc21   : > { %2031 = vrsqrt.f32 %v1409_v27 }
 0xc2b   : > { %v2032_v30 = vpop.eup %2031 }
 0xc2c   : > { %v1411_v32 = vmul.f32 %v2032_v30, %v1403_v11 }
 0xc2e   : > { %v1418_v34 = vmul.f32 %v1826_v31, %v1411_v32 }
 0xc30   : > { %v1425_v35 = vadd.f32 %v1827_v33, %v1418_v34 }
 0xc32   : > { %v1426_v36 = vpack.c.bf16 %v1425_v35, %v1425_v35 }
 0xc34   : > { %1836 = vmatmul.mubr.msk.bf16.vlgmr.msra.gmra.mrb[12].mxu0 %vm481_vm0, %v1426_v36 }
 0xd07   : > { %v1524_v57 = vpop.f32.mrb[12].mxu0 }
 0xd08   : > { %v1525_v58 = vadd.f32 %v1524_v57, %v1440_v55  ;;  %v1526_v59 = vpop.f32.mrb[13].mxu0 }
 0xd09   : > { %v1527_v60 = vadd.f32 %v1526_v59, %v1444_v56  ;;  %v1528_v61 = vpop.f32.mrb[14].mxu0 }
 0xd0a   : > { %v1533_v63 = vmul.f32 0.044715, %v1525_v58  ;;  %v1529_v26 = vpop.f32.mrb[15].mxu0  ;;  %v1531_v37 = vmul.f32 0.5, %v1525_v58 }
 0xd0b   : > { %v1534_v1 = vmul.f32 0.044715, %v1527_v60  ;;  %v1532_v12 = vmul.f32 0.5, %v1527_v60 }
 0xd0c   : > { %v1535_v2 = vmul.f32 %v1533_v63, %v1525_v58 }
 0xd0d   : > { %v1536_v3 = vmul.f32 %v1534_v1, %v1527_v60 }
 0xd0e   : > { %v1537_v4 = vmul.f32 %v1535_v2, %v1525_v58 }
 0xd0f   : > { %v1538_v5 = vmul.f32 %v1536_v3, %v1527_v60 }
 0xd10   : > { %v1539_v6 = vadd.f32 %v1537_v4, %v1525_v58 }
 0xd11   : > { %v1540_v7 = vadd.f32 %v1538_v5, %v1527_v60 }
 0xd12   : > { %v1541_v8 = vmul.f32 0.7978846, %v1539_v6 }
 0xd13   : > { %v1542_v9 = vmul.f32 0.7978846, %v1540_v7 }
 0xd14   : > { %2033 = vtanh.f32 %v1541_v8 }
 0xd15   : > { %2035 = vtanh.f32 %v1542_v9 }
 0xd1e   : > { %v2034_v28 = vpop.eup %2033 }
 0xd1f   : > { %v2036_v29 = vpop.eup %2035  ;;  %v1545_v62 = vadd.f32 1.0, %v2034_v28 }
 0xd20   : > { %v1546_v13 = vadd.f32 1.0, %v2036_v29 }
 0xd21   : > { %v1547_v14 = vmul.f32 %v1545_v62, %v1531_v37 }
 0xd22   : > { %v1548_v11 = vmul.f32 %v1546_v13, %v1532_v12 }
 0xd23   : > { %v1549_v16 = vpack.c.bf16 %v1547_v14, %v1547_v14 }
 0xd24   : > { %v1550_v15 = vpack.c.bf16 %v1548_v11, %v1548_v11 }
 0xd26   : > { %1718 = vmatprep.mubr.bf16.mxu1 %v1550_v15 }
 0xd27   : > { %1719 = vmatmul.mubr.bf16.vlgmr.msra.gmra.mrb[12].mxu1 %v1549_v16 }
 0xdfa   : > { %v1893_v17 = vpop.f32.mrb[12].mxu1 }
 0xdfb   : > { %v1894_v18 = vpop.f32.mrb[13].mxu1 }
 0xdfc   : > { %v1895_v19 = vadd.f32 %v1894_v18, %v1893_v17  ;;  %v1896_v20 = vpop.f32.mrb[14].mxu1 }
 0xdfd   : > { %v1897_v21 = vpop.f32.mrb[15].mxu1 }
 0xdfe   : > { %v1721_v22 = vadd.f32 %v1895_v19, %v1837_v0 }
 0xe00   : > { %v1726_v23 = vadd.f32 %v1721_v22, %v2313_v10 }
 0xe02   : > { %1727 = vst.msk [vmem:[%s476_s16] sm:$0xff] %vm481_vm0, %v1726_v23 }
 0xe03 PF: > { %s24_s29 = sadd.s32 1, %s2043_s29  }
 0xe04   : > { %p21_p4 = scmp.ge.s32.totalorder %s24_s29, 4  }
 0xe06   :  { %23 = sbr.rel (!%p21_p4) target bundleno = 1 (0x1), region = 109 }

</bundles_post_ra>
